<compile_context>
chip_gen: v6e
topology: v6e:2x2x1
jax: 0.10.0
libtpu: 0.0.40
codegen_flags: <defaults>
</compile_context>

<pallas_src>
import functools

import numpy as np
import jax
import jax.numpy as jnp
from jax.experimental import pallas as pl
from jax.experimental.pallas import tpu as pltpu

POOL_SCALES = (1, 2, 3, 6)
SCALE_SIZES = tuple(s * s for s in POOL_SCALES)                          # (1, 4, 9, 36)
SCALE_OFFS = tuple(int(x) for x in np.cumsum((0,) + SCALE_SIZES[:-1]))   # (0, 1, 5, 14)
PTOT = 64                      # packed pooled rows (1 + 4 + 9 + 36 = 50, padded to 64)
PPM_CH = 256
KC = len(POOL_SCALES) * PPM_CH          # 1024
LEAKY_SLOPE = 0.01
BN_EPS = 1e-5


def _round_up(x, m):
    return (x + m - 1) // m * m


def _choose_hw_tiling(hw):
    """Pick a 128-aligned HW tile and the padded HW extent (multiple of the tile)."""
    hw128 = _round_up(hw, 128)
    if hw128 <= 512:
        return hw128, hw128                       # single tile, still lane/sublane aligned
    for t in (512, 256, 128):
        pad = _round_up(hw, t)
        if pad * 8 <= hw128 * 9:                  # accept <=12.5% padding for bigger tiles
            return t, pad
    return 128, hw128


def _vmem_limits():
    """(two_call_limit, fused_limit) in bytes, per TPU generation."""
    try:
        kind = jax.devices()[0].device_kind.lower()
    except Exception:
        kind = ""
    if "v5" in kind or "v6" in kind:              # 128 MiB physical VMEM
        return 64 * 1024 * 1024, 96 * 1024 * 1024
    # v7x (64 MiB per TensorCore) and unknown devices: stay conservative.
    return 32 * 1024 * 1024, 32 * 1024 * 1024


def _fused_vmem_bytes(hw_pad, c_in_pad, c_out_pad, t_hw):
    """Conservative VMEM footprint estimate of the fused (resident-x) kernel."""
    x_blk = hw_pad * c_in_pad * 2                         # bf16 per-batch block
    o_blk = hw_pad * c_out_pad * 2                        # bf16 per-batch output block
    weights = (c_in_pad * KC * 2 + KC * c_out_pad * 2     # wwide, wfold
               + c_in_pad * c_out_pad * 2                 # woutx
               + PTOT * KC * 4                            # mask
               + 2 * hw_pad * PTOT * 2                    # p_all + u_all
               + (KC + c_out_pad) * 4)                    # biases
    temps = (PTOT * c_in_pad * 4                          # pooled accumulator
             + 2 * PTOT * KC * 4                          # wide-matmul intermediates
             + 2 * t_hw * (c_in_pad + c_out_pad) * 4)     # per-chunk working set
    # inputs/outputs are double-buffered by the pipeline; count weights 2x too.
    return 2 * (x_blk + o_blk) + 2 * weights + temps


# ----------------------------- Pallas kernels ------------------------------ #
def ppm_fused_kernel(x_ref, p_ref, u_ref, wwide_ref, bwide_ref, mask_ref,
                     wfold_ref, woutx_ref, bout_ref, o_ref, *, t_hw, n_chunks):
    c_in_pad = x_ref.shape[2]
    # ---- pass 1: packed adaptive-avg-pool  pooled = P_all @ x.
    # x is DMA'd from HBM once and stays resident in VMEM; the static chunking
    # only bounds in-kernel temporaries.
    pooled = jnp.zeros((PTOT, c_in_pad), jnp.float32)
    for i in range(n_chunks):
        sl = slice(i * t_hw, (i + 1) * t_hw)
        pooled = pooled + jnp.dot(p_ref[:, sl], x_ref[0, sl, :],
                                  preferred_element_type=jnp.float32)
    # ---- epilogue: all four 1x1 convs (+ folded eval-mode BN) as one wide
    # matmul, LeakyReLU, per-scale block mask, folded through out_conv weights.
    y = jnp.dot(pooled.astype(jnp.bfloat16), wwide_ref[...],
                preferred_element_type=jnp.float32) + bwide_ref[...]
    y = jnp.where(y > 0, y, LEAKY_SLOPE * y) * mask_ref[...]
    z = jnp.dot(y.astype(jnp.bfloat16), wfold_ref[...],
                preferred_element_type=jnp.float32).astype(jnp.bfloat16)
    # ---- pass 2: out = x @ W_outx + b_out + U_all @ Z, re-using resident x.
    for i in range(n_chunks):
        sl = slice(i * t_hw, (i + 1) * t_hw)
        acc = jnp.dot(x_ref[0, sl, :], woutx_ref[...],
                      preferred_element_type=jnp.float32)
        acc = acc + bout_ref[...]
        acc = acc + jnp.dot(u_ref[sl, :], z, preferred_element_type=jnp.float32)
        o_ref[0, sl, :] = acc.astype(o_ref.dtype)


def ppm_pool_kernel(x_ref, p_ref, wwide_ref, bwide_ref, mask_ref, wfold_ref,
                    z_ref, pooled_acc):
    h = pl.program_id(1)

    @pl.when(h == 0)
    def _():
        pooled_acc[...] = jnp.zeros_like(pooled_acc)

    # adaptive avg-pool (all 4 scales packed) as a single matmul over this HW tile
    pooled_acc[...] += jnp.dot(p_ref[...], x_ref[0],
                               preferred_element_type=jnp.float32)

    @pl.when(h == pl.num_programs(1) - 1)
    def _():
        y = jnp.dot(pooled_acc[...].astype(jnp.bfloat16), wwide_ref[...],
                    preferred_element_type=jnp.float32) + bwide_ref[...]
        y = jnp.where(y > 0, y, LEAKY_SLOPE * y) * mask_ref[...]
        z_ref[0] = jnp.dot(y.astype(jnp.bfloat16), wfold_ref[...],
                           preferred_element_type=jnp.float32).astype(z_ref.dtype)


def ppm_out_kernel(x_ref, u_ref, z_ref, woutx_ref, bout_ref, o_ref):
    acc = jnp.dot(x_ref[0], woutx_ref[...], preferred_element_type=jnp.float32)
    acc = acc + bout_ref[...]
    acc = acc + jnp.dot(u_ref[...], z_ref[0].astype(jnp.bfloat16),
                        preferred_element_type=jnp.float32)
    o_ref[0] = acc.astype(o_ref.dtype)


def ppm_pallas(x_flat, p_all, u_all, packed, *, t_hw, force_two_call=False):
    N, hw_pad, c_in_pad = x_flat.shape
    c_out_pad = packed["woutx"].shape[1]
    assert hw_pad % t_hw == 0
    n_hw = hw_pad // t_hw
    two_call_limit, fused_limit = _vmem_limits()

    def full(a, nargs):
        nd = a.ndim
        if nargs == 1:
            return pl.BlockSpec(a.shape, lambda n, _nd=nd: (0,) * _nd)
        return pl.BlockSpec(a.shape, lambda i, j, _nd=nd: (0,) * _nd)

    weights = (packed["wwide"], packed["bwide"], packed["mask"],
               packed["wfold"], packed["woutx"], packed["bout"])
    w_bytes = int(sum(int(w.size) * w.dtype.itemsize for w in weights)
                  + p_all.size * 2 + u_all.size * 2)

    use_fused = (not force_two_call and
                 _fused_vmem_bytes(hw_pad, c_in_pad, c_out_pad, t_hw)
                 <= int(0.85 * fused_limit))

    if use_fused:
        # ---- single fused call: x read from HBM exactly once per batch.
        flops = N * (2 * PTOT * hw_pad * c_in_pad + 2 * PTOT * c_in_pad * KC
                     + 2 * PTOT * KC * c_out_pad
                     + 2 * hw_pad * c_in_pad * c_out_pad
                     + 2 * hw_pad * PTOT * c_out_pad)
        bytes_acc = int(x_flat.size * 2 + w_bytes + N * hw_pad * c_out_pad * 2)
        kernel = functools.partial(ppm_fused_kernel, t_hw=t_hw, n_chunks=n_hw)
        return pl.pallas_call(
            kernel,
            out_shape=jax.ShapeDtypeStruct((N, hw_pad, c_out_pad), jnp.bfloat16),
            grid=(N,),
            in_specs=[
                pl.BlockSpec((1, hw_pad, c_in_pad), lambda n: (n, 0, 0)),
                full(p_all, 1), full(u_all, 1),
                full(packed["wwide"], 1), full(packed["bwide"], 1),
                full(packed["mask"], 1), full(packed["wfold"], 1),
                full(packed["woutx"], 1), full(packed["bout"], 1),
            ],
            out_specs=pl.BlockSpec((1, hw_pad, c_out_pad), lambda n: (n, 0, 0)),
            compiler_params=pltpu.CompilerParams(
                dimension_semantics=("parallel",),
                vmem_limit_bytes=fused_limit),
            cost_estimate=pl.CostEstimate(flops=flops, transcendentals=0,
                                          bytes_accessed=bytes_acc),
        )(x_flat, p_all, u_all, packed["wwide"], packed["bwide"],
          packed["mask"], packed["wfold"], packed["woutx"], packed["bout"])

    # ---- two-call fallback ----
    # kernel A: packed pooling over HW (reduction grid axis, VMEM scratch acc)
    #           + wide conv/BN/act + out_conv fold -> Z (f32, tiny).
    flops_a = N * (2 * PTOT * hw_pad * c_in_pad + 2 * PTOT * c_in_pad * KC
                   + 2 * PTOT * KC * c_out_pad)
    bytes_a = int(x_flat.size * 2 + p_all.size * 2
                  + packed["wwide"].size * 2 + packed["wfold"].size * 2
                  + packed["mask"].size * 4 + packed["bwide"].size * 4
                  + N * PTOT * c_out_pad * 4)
    z = pl.pallas_call(
        ppm_pool_kernel,
        out_shape=jax.ShapeDtypeStruct((N, PTOT, c_out_pad), jnp.float32),
        grid=(N, n_hw),
        in_specs=[
            pl.BlockSpec((1, t_hw, c_in_pad), lambda n, h: (n, h, 0)),
            pl.BlockSpec((PTOT, t_hw), lambda n, h: (0, h)),
            full(packed["wwide"], 2), full(packed["bwide"], 2),
            full(packed["mask"], 2), full(packed["wfold"], 2),
        ],
        out_specs=pl.BlockSpec((1, PTOT, c_out_pad), lambda n, h: (n, 0, 0)),
        scratch_shapes=[pltpu.VMEM((PTOT, c_in_pad), jnp.float32)],
        compiler_params=pltpu.CompilerParams(
            dimension_semantics=("parallel", "arbitrary"),
            vmem_limit_bytes=two_call_limit),
        cost_estimate=pl.CostEstimate(flops=flops_a, transcendentals=0,
                                      bytes_accessed=bytes_a),
    )(x_flat, p_all, packed["wwide"], packed["bwide"], packed["mask"],
      packed["wfold"])

    # kernel B: identity out_conv + upsampled (already folded) branch term.
    # Grid is (hw tiles, batch): big parallel axis leads for megacore sharding.
    flops_b = N * (2 * hw_pad * c_in_pad * c_out_pad + 2 * hw_pad * PTOT * c_out_pad)
    bytes_b = int(x_flat.size * 2 + u_all.size * 2 + z.size * 4
                  + packed["woutx"].size * 2 + packed["bout"].size * 4
                  + N * hw_pad * c_out_pad * 2)
    out = pl.pallas_call(
        ppm_out_kernel,
        out_shape=jax.ShapeDtypeStruct((N, hw_pad, c_out_pad), jnp.bfloat16),
        grid=(n_hw, N),
        in_specs=[
            pl.BlockSpec((1, t_hw, c_in_pad), lambda h, n: (n, h, 0)),
            pl.BlockSpec((t_hw, PTOT), lambda h, n: (h, 0)),
            pl.BlockSpec((1, PTOT, c_out_pad), lambda h, n: (n, 0, 0)),
            full(packed["woutx"], 2), full(packed["bout"], 2),
        ],
        out_specs=pl.BlockSpec((1, t_hw, c_out_pad), lambda h, n: (n, h, 0)),
        compiler_params=pltpu.CompilerParams(
            dimension_semantics=("parallel", "parallel"),
            vmem_limit_bytes=two_call_limit),
        cost_estimate=pl.CostEstimate(flops=flops_b, transcendentals=0,
                                      bytes_accessed=bytes_b),
    )(x_flat, u_all, z, packed["woutx"], packed["bout"])
    return out


# --------------------------- glue (plain JAX/np) ---------------------------- #
def _adaptive_pool_mat(in_size, out_size):
    # PyTorch AdaptiveAvgPool2d bins: [floor(i*in/out), ceil((i+1)*in/out))
    M = np.zeros((out_size, in_size), dtype=np.float32)
    for i in range(out_size):
        start = (i * in_size) // out_size
        end = -((-(i + 1) * in_size) // out_size)
        M[i, start:end] = 1.0 / float(end - start)
    return M


def _bilinear_mat(out_size, in_size):
    # PyTorch F.interpolate(mode='bilinear', align_corners=False)
    M = np.zeros((out_size, in_size), dtype=np.float32)
    scale = in_size / out_size
    for o in range(out_size):
        src = max((o + 0.5) * scale - 0.5, 0.0)
        i0 = min(int(np.floor(src)), in_size - 1)
        i1 = min(i0 + 1, in_size - 1)
        lam = src - i0
        M[o, i0] += 1.0 - lam
        M[o, i1] += lam
    return M


def _per_scale_mats(H, W):
    P_list, U_list = [], []
    for s in POOL_SCALES:
        Ph, Pw = _adaptive_pool_mat(H, s), _adaptive_pool_mat(W, s)
        Uh, Uw = _bilinear_mat(H, s), _bilinear_mat(W, s)
        P = (Ph[:, None, :, None] * Pw[None, :, None, :]).reshape(s * s, H * W)
        U = (Uh[:, None, :, None] * Uw[None, :, None, :]).reshape(H * W, s * s)
        P_list.append(P)
        U_list.append(U)
    return P_list, U_list


@functools.lru_cache(maxsize=16)
def packed_spatial_mats(H, W, hw_pad):
    """Packed pooling (PTOT, hw_pad) / upsample (hw_pad, PTOT) mats, cached per (H, W)."""
    P_list, U_list = _per_scale_mats(H, W)
    HW = H * W
    P_all = np.zeros((PTOT, hw_pad), np.float32)     # zero cols for HW pad pixels
    U_all = np.zeros((hw_pad, PTOT), np.float32)     # zero rows for HW pad pixels
    for off, s2, P, U in zip(SCALE_OFFS, SCALE_SIZES, P_list, U_list):
        P_all[off:off + s2, :HW] = P
        U_all[:HW, off:off + s2] = U
    return jnp.asarray(P_all, jnp.bfloat16), jnp.asarray(U_all, jnp.bfloat16)


def _branch_mask():
    m = np.zeros((PTOT, KC), np.float32)
    for k, (off, s2) in enumerate(zip(SCALE_OFFS, SCALE_SIZES)):
        m[off:off + s2, k * PPM_CH:(k + 1) * PPM_CH] = 1.0
    return m


def init_params(key, c_in, c_out):
    n_scales = len(POOL_SCALES)
    keys = jax.random.split(key, 6 * n_scales + 2)
    wppm, bppm = [], []
    for k in range(n_scales):
        kw, kb, kg, kbe, km, kv = keys[6 * k:6 * k + 6]
        w = 0.05 * jax.random.normal(kw, (c_in, PPM_CH), jnp.float32)       # conv (C_in,256)
        b = 0.02 * jax.random.normal(kb, (PPM_CH,), jnp.float32)
        gamma = 1.0 + 0.1 * jax.random.normal(kg, (PPM_CH,), jnp.float32)
        beta = 0.05 * jax.random.normal(kbe, (PPM_CH,), jnp.float32)
        mean = 0.1 * jax.random.normal(km, (PPM_CH,), jnp.float32)
        var = 0.5 + jnp.abs(jax.random.normal(kv, (PPM_CH,), jnp.float32))
        s = gamma / jnp.sqrt(var + BN_EPS)
        wppm.append(w * s[None, :])                                          # folded conv+BN
        bppm.append(((b - mean) * s + beta)[None, :])                        # (1,256)
    c_total = c_in + n_scales * PPM_CH
    w_out = 0.02 * jax.random.normal(keys[-2], (c_total, c_out), jnp.float32)
    b_out = 0.01 * jax.random.normal(keys[-1], (1, c_out), jnp.float32)
    woutppm = jnp.stack([w_out[c_in + k * PPM_CH: c_in + (k + 1) * PPM_CH]
                         for k in range(n_scales)])
    return dict(wppm=jnp.stack(wppm), bppm=jnp.stack(bppm),
                woutppm=woutppm, woutx=w_out[:c_in], bout=b_out)


def pack_params(params, c_in, c_out):
    """Pack per-scale weights into wide/fold matrices, pad channels to 128, cast bf16."""
    K = len(POOL_SCALES)
    c_in_pad = _round_up(c_in, 128)
    c_out_pad = _round_up(c_out, 128)
    wwide = jnp.concatenate([params["wppm"][k] for k in range(K)], axis=1)      # (c_in, KC)
    wwide = jnp.pad(wwide, ((0, c_in_pad - c_in), (0, 0))).astype(jnp.bfloat16)
    bwide = jnp.concatenate([params["bppm"][k] for k in range(K)], axis=1)      # (1, KC)
    wfold = jnp.concatenate([params["woutppm"][k] for k in range(K)], axis=0)   # (KC, c_out)
    wfold = jnp.pad(wfold, ((0, 0), (0, c_out_pad - c_out))).astype(jnp.bfloat16)
    woutx = jnp.pad(params["woutx"],
                    ((0, c_in_pad - c_in), (0, c_out_pad - c_out))).astype(jnp.bfloat16)
    bout = jnp.pad(params["bout"], ((0, 0), (0, c_out_pad - c_out))).astype(jnp.float32)
    return dict(wwide=wwide, bwide=bwide.astype(jnp.float32), wfold=wfold,
                woutx=woutx, bout=bout,
                mask=jnp.asarray(_branch_mask(), jnp.float32),
                c_in=c_in, c_out=c_out, c_in_pad=c_in_pad, c_out_pad=c_out_pad)


def ppm_forward(x_list, packed, *, force_two_call=False):
    """x_list: list of NCHW feature maps. Replaces the last one, like PyTorch."""
    feat = x_list[-1]
    N, C_in, H, W = feat.shape
    assert C_in == packed["c_in"]
    HW = H * W
    c_in_pad = packed["c_in_pad"]
    t_hw, hw_pad = _choose_hw_tiling(HW)
    x_flat = jnp.transpose(feat, (0, 2, 3, 1)).reshape(N, HW, C_in)
    x_flat = jnp.pad(x_flat, ((0, 0), (0, hw_pad - HW), (0, c_in_pad - C_in)))
    x_flat = x_flat.astype(jnp.bfloat16)
    p_all, u_all = packed_spatial_mats(H, W, hw_pad)
    out_flat = ppm_pallas(x_flat, p_all, u_all, packed, t_hw=t_hw,
                          force_two_call=force_two_call)
    c_out = packed["c_out"]
    # slice / reshape / transpose in bf16, upcast to f32 only at the end.
    out = out_flat[:, :HW, :c_out].reshape(N, H, W, c_out)
    out = jnp.transpose(out, (0, 3, 1, 2)).astype(jnp.float32)
    return x_list[:-1] + [out]


def _reference(x_last, params):
    """Pure-JAX f32 reference (original per-scale math)."""
    N, C_in, H, W = x_last.shape
    P_list, U_list = _per_scale_mats(H, W)
    xf = jnp.transpose(x_last, (0, 2, 3, 1)).reshape(N, H * W, C_in)
    acc = xf @ params["woutx"] + params["bout"]
    for k in range(len(POOL_SCALES)):
        pooled = jnp.einsum("ph,nhc->npc", jnp.asarray(P_list[k]), xf)
        y = pooled @ params["wppm"][k] + params["bppm"][k]
        y = jnp.where(y > 0, y, LEAKY_SLOPE * y)
        up = jnp.einsum("hp,npc->nhc", jnp.asarray(U_list[k]), y)
        acc = acc + up @ params["woutppm"][k]
    return acc.reshape(N, H, W, C_in).transpose(0, 3, 1, 2)


# --------------------------------- main ------------------------------------ #
if __name__ == "__main__":
    key = jax.random.PRNGKey(0)
    kp, kx0, kx1, kx2 = jax.random.split(key, 4)
    N, C_in = 2, 4
    params = init_params(kp, C_in, C_in)            # target_out defaults to in_shape
    packed = pack_params(params, C_in, C_in)

    x_early = jax.random.normal(kx0, (N, 8, 32, 32), jnp.float32)   # passed through untouched

    # (16,16): aligned HW; (15,15): exercises the HW-padding path (225 -> 256).
    for (H, W), kx in (((16, 16), kx1), ((15, 15), kx2)):
        x_last = jax.random.normal(kx, (N, C_in, H, W), jnp.float32)
        ref = np.asarray(_reference(x_last, params))
        for force_two_call in (False, True):        # exercise both the fused and fallback paths
            out_list = ppm_forward([x_early, x_last], packed,
                                   force_two_call=force_two_call)
            out = jax.block_until_ready(out_list[-1])
            assert out.shape == (N, C_in, H, W)
            assert out_list[0].shape == x_early.shape
            # bf16 MXU operands + bf16 output storage (f32 accumulation) -> loose tolerance.
            np.testing.assert_allclose(np.asarray(out), ref, rtol=2e-2, atol=2e-2)

    print("KERNEL_OK")
</pallas_src>

<mosaic_0001>
module attributes {stable_mosaic.version = 11 : i64} {
  func.func @ppm_fused_kernel(%arg0: i32, %arg1: memref<1x256x128xbf16, #tpu.memory_space<vmem>>, %arg2: memref<64x256xbf16, #tpu.memory_space<vmem>>, %arg3: memref<256x64xbf16, #tpu.memory_space<vmem>>, %arg4: memref<128x1024xbf16, #tpu.memory_space<vmem>>, %arg5: memref<1x1024xf32, #tpu.memory_space<vmem>>, %arg6: memref<64x1024xf32, #tpu.memory_space<vmem>>, %arg7: memref<1024x128xbf16, #tpu.memory_space<vmem>>, %arg8: memref<128x128xbf16, #tpu.memory_space<vmem>>, %arg9: memref<1x128xf32, #tpu.memory_space<vmem>>, %arg10: memref<1x256x128xbf16, #tpu.memory_space<vmem>>) attributes {dimension_semantics = [#tpu.dimension_semantics<parallel>], iteration_bounds = array<i64: 2>, scalar_prefetch = 0 : i64, scratch_operands = 0 : i64, tpu.core_type = #tpu.core_type<tc>, window_params = [{transform_indices = @transform_0, window_bounds = array<i64: 1, 256, 128>}, {pipeline_mode = #tpu.pipeline_mode<synchronous>, transform_indices = @transform_1, window_bounds = array<i64: 64, 256>}, {pipeline_mode = #tpu.pipeline_mode<synchronous>, transform_indices = @transform_2, window_bounds = array<i64: 256, 64>}, {pipeline_mode = #tpu.pipeline_mode<synchronous>, transform_indices = @transform_3, window_bounds = array<i64: 128, 1024>}, {pipeline_mode = #tpu.pipeline_mode<synchronous>, transform_indices = @transform_4, window_bounds = array<i64: 1, 1024>}, {pipeline_mode = #tpu.pipeline_mode<synchronous>, transform_indices = @transform_5, window_bounds = array<i64: 64, 1024>}, {pipeline_mode = #tpu.pipeline_mode<synchronous>, transform_indices = @transform_6, window_bounds = array<i64: 1024, 128>}, {pipeline_mode = #tpu.pipeline_mode<synchronous>, transform_indices = @transform_7, window_bounds = array<i64: 128, 128>}, {pipeline_mode = #tpu.pipeline_mode<synchronous>, transform_indices = @transform_8, window_bounds = array<i64: 1, 128>}, {transform_indices = @transform_9, window_bounds = array<i64: 1, 256, 128>}]} {
    %cst = arith.constant 0.000000e+00 : f32
    %0 = vector.broadcast %cst : f32 to vector<64x128xf32>
    %c0 = arith.constant 0 : index
    %c0_0 = arith.constant 0 : index
    %1 = vector.load %arg2[%c0, %c0_0] : memref<64x256xbf16, #tpu.memory_space<vmem>>, vector<64x256xbf16>
    %c0_1 = arith.constant 0 : index
    %c0_2 = arith.constant 0 : index
    %c0_3 = arith.constant 0 : index
    %2 = vector.load %arg1[%c0_1, %c0_2, %c0_3] : memref<1x256x128xbf16, #tpu.memory_space<vmem>>, vector<1x256x128xbf16>
    %3 = vector.shape_cast %2 : vector<1x256x128xbf16> to vector<256x128xbf16>
    %cst_4 = arith.constant dense<0.000000e+00> : vector<64x128xf32>
    %4 = tpu.matmul %1, %3, %cst_4 {dimension_numbers = #tpu.dot_dimension_numbers<[1], [0], [0], [1], [0, 0, 1, 1], [], []>} : vector<64x256xbf16>, vector<256x128xbf16>, vector<64x128xf32> -> vector<64x128xf32>
    %5 = arith.addf %0, %4 : vector<64x128xf32>
    %6 = arith.truncf %5 : vector<64x128xf32> to vector<64x128xbf16>
    %c0_5 = arith.constant 0 : index
    %c0_6 = arith.constant 0 : index
    %7 = vector.load %arg4[%c0_5, %c0_6] : memref<128x1024xbf16, #tpu.memory_space<vmem>>, vector<128x1024xbf16>
    %cst_7 = arith.constant dense<0.000000e+00> : vector<64x1024xf32>
    %8 = tpu.matmul %6, %7, %cst_7 {dimension_numbers = #tpu.dot_dimension_numbers<[1], [0], [0], [1], [0, 0, 1, 1], [], []>} : vector<64x128xbf16>, vector<128x1024xbf16>, vector<64x1024xf32> -> vector<64x1024xf32>
    %c0_8 = arith.constant 0 : index
    %c0_9 = arith.constant 0 : index
    %9 = vector.load %arg5[%c0_8, %c0_9] : memref<1x1024xf32, #tpu.memory_space<vmem>>, vector<1x1024xf32>
    %10 = vector.broadcast %9 : vector<1x1024xf32> to vector<64x1024xf32>
    %11 = arith.addf %8, %10 : vector<64x1024xf32>
    %cst_10 = arith.constant 0.000000e+00 : f32
    %12 = vector.broadcast %cst_10 : f32 to vector<64x1024xf32>
    %13 = arith.cmpf ogt, %11, %12 : vector<64x1024xf32>
    %cst_11 = arith.constant 0.00999999977 : f32
    %14 = vector.broadcast %cst_11 : f32 to vector<64x1024xf32>
    %15 = arith.mulf %14, %11 : vector<64x1024xf32>
    %16 = arith.select %13, %11, %15 : vector<64x1024xi1>, vector<64x1024xf32>
    %c0_12 = arith.constant 0 : index
    %c0_13 = arith.constant 0 : index
    %17 = vector.load %arg6[%c0_12, %c0_13] : memref<64x1024xf32, #tpu.memory_space<vmem>>, vector<64x1024xf32>
    %18 = arith.mulf %16, %17 : vector<64x1024xf32>
    %19 = arith.truncf %18 : vector<64x1024xf32> to vector<64x1024xbf16>
    %c0_14 = arith.constant 0 : index
    %c0_15 = arith.constant 0 : index
    %20 = vector.load %arg7[%c0_14, %c0_15] : memref<1024x128xbf16, #tpu.memory_space<vmem>>, vector<1024x128xbf16>
    %cst_16 = arith.constant dense<0.000000e+00> : vector<64x128xf32>
    %21 = tpu.matmul %19, %20, %cst_16 {dimension_numbers = #tpu.dot_dimension_numbers<[1], [0], [0], [1], [0, 0, 1, 1], [], []>} : vector<64x1024xbf16>, vector<1024x128xbf16>, vector<64x128xf32> -> vector<64x128xf32>
    %22 = arith.truncf %21 : vector<64x128xf32> to vector<64x128xbf16>
    %c0_17 = arith.constant 0 : index
    %c0_18 = arith.constant 0 : index
    %c0_19 = arith.constant 0 : index
    %23 = vector.load %arg1[%c0_17, %c0_18, %c0_19] : memref<1x256x128xbf16, #tpu.memory_space<vmem>>, vector<1x256x128xbf16>
    %24 = vector.shape_cast %23 : vector<1x256x128xbf16> to vector<256x128xbf16>
    %c0_20 = arith.constant 0 : index
    %c0_21 = arith.constant 0 : index
    %25 = vector.load %arg8[%c0_20, %c0_21] : memref<128x128xbf16, #tpu.memory_space<vmem>>, vector<128x128xbf16>
    %cst_22 = arith.constant dense<0.000000e+00> : vector<256x128xf32>
    %26 = tpu.matmul %24, %25, %cst_22 {dimension_numbers = #tpu.dot_dimension_numbers<[1], [0], [0], [1], [0, 0, 1, 1], [], []>} : vector<256x128xbf16>, vector<128x128xbf16>, vector<256x128xf32> -> vector<256x128xf32>
    %c0_23 = arith.constant 0 : index
    %c0_24 = arith.constant 0 : index
    %27 = vector.load %arg9[%c0_23, %c0_24] : memref<1x128xf32, #tpu.memory_space<vmem>>, vector<1x128xf32>
    %28 = vector.broadcast %27 : vector<1x128xf32> to vector<256x128xf32>
    %29 = arith.addf %26, %28 : vector<256x128xf32>
    %c0_25 = arith.constant 0 : index
    %c0_26 = arith.constant 0 : index
    %30 = vector.load %arg3[%c0_25, %c0_26] : memref<256x64xbf16, #tpu.memory_space<vmem>>, vector<256x64xbf16>
    %cst_27 = arith.constant dense<0.000000e+00> : vector<256x128xf32>
    %31 = tpu.matmul %30, %22, %cst_27 {dimension_numbers = #tpu.dot_dimension_numbers<[1], [0], [0], [1], [0, 0, 1, 1], [], []>} : vector<256x64xbf16>, vector<64x128xbf16>, vector<256x128xf32> -> vector<256x128xf32>
    %32 = arith.addf %29, %31 : vector<256x128xf32>
    %33 = arith.truncf %32 : vector<256x128xf32> to vector<256x128xbf16>
    %c0_28 = arith.constant 0 : index
    %c0_29 = arith.constant 0 : index
    %c0_30 = arith.constant 0 : index
    %34 = vector.load %arg10[%c0_28, %c0_29, %c0_30] : memref<1x256x128xbf16, #tpu.memory_space<vmem>>, vector<1x256x128xbf16>
    %35 = vector.shape_cast %34 : vector<1x256x128xbf16> to vector<256x128xbf16>
    %36 = vector.shape_cast %33 : vector<256x128xbf16> to vector<1x256x128xbf16>
    tpu.vector_store %arg10[%c0_28, %c0_29, %c0_30], %36 {strides = array<i32>} : memref<1x256x128xbf16, #tpu.memory_space<vmem>>, vector<1x256x128xbf16>,
    return
  }
  func.func @transform_0(%arg0: i32) -> (i32, i32, i32) {
    %c0_i32 = arith.constant 0 : i32
    %c0_i32_0 = arith.constant 0 : i32
    %c0_i32_1 = arith.constant 0 : i32
    return %arg0, %c0_i32, %c0_i32_0 : i32, i32, i32
  }
  func.func @transform_1(%arg0: i32) -> (i32, i32) {
    %c0_i32 = arith.constant 0 : i32
    %c0_i32_0 = arith.constant 0 : i32
    %c0_i32_1 = arith.constant 0 : i32
    return %c0_i32, %c0_i32_0 : i32, i32
  }
  func.func @transform_2(%arg0: i32) -> (i32, i32) {
    %c0_i32 = arith.constant 0 : i32
    %c0_i32_0 = arith.constant 0 : i32
    %c0_i32_1 = arith.constant 0 : i32
    return %c0_i32, %c0_i32_0 : i32, i32
  }
  func.func @transform_3(%arg0: i32) -> (i32, i32) {
    %c0_i32 = arith.constant 0 : i32
    %c0_i32_0 = arith.constant 0 : i32
    %c0_i32_1 = arith.constant 0 : i32
    return %c0_i32, %c0_i32_0 : i32, i32
  }
  func.func @transform_4(%arg0: i32) -> (i32, i32) {
    %c0_i32 = arith.constant 0 : i32
    %c0_i32_0 = arith.constant 0 : i32
    %c0_i32_1 = arith.constant 0 : i32
    return %c0_i32, %c0_i32_0 : i32, i32
  }
  func.func @transform_5(%arg0: i32) -> (i32, i32) {
    %c0_i32 = arith.constant 0 : i32
    %c0_i32_0 = arith.constant 0 : i32
    %c0_i32_1 = arith.constant 0 : i32
    return %c0_i32, %c0_i32_0 : i32, i32
  }
  func.func @transform_6(%arg0: i32) -> (i32, i32) {
    %c0_i32 = arith.constant 0 : i32
    %c0_i32_0 = arith.constant 0 : i32
    %c0_i32_1 = arith.constant 0 : i32
    return %c0_i32, %c0_i32_0 : i32, i32
  }
  func.func @transform_7(%arg0: i32) -> (i32, i32) {
    %c0_i32 = arith.constant 0 : i32
    %c0_i32_0 = arith.constant 0 : i32
    %c0_i32_1 = arith.constant 0 : i32
    return %c0_i32, %c0_i32_0 : i32, i32
  }
  func.func @transform_8(%arg0: i32) -> (i32, i32) {
    %c0_i32 = arith.constant 0 : i32
    %c0_i32_0 = arith.constant 0 : i32
    %c0_i32_1 = arith.constant 0 : i32
    return %c0_i32, %c0_i32_0 : i32, i32
  }
  func.func @transform_9(%arg0: i32) -> (i32, i32, i32) {
    %c0_i32 = arith.constant 0 : i32
    %c0_i32_0 = arith.constant 0 : i32
    %c0_i32_1 = arith.constant 0 : i32
    return %arg0, %c0_i32, %c0_i32_0 : i32, i32, i32
  }
}

</mosaic_0001>

<bundles_post_ra>
// kernel: tpu_custom_call.1
= control target key start
LH: loop header
LB: loop body
LE: loop exit
PB: predicated region body
PF: predicated region fallthrough
CT: control target
= control target key end

     0   :  { %s5450_s0 = inlined_call_operand.hbm [shape: bf16[2,256,128], index: 0, kind: input, shape index: {}]   ;;  %s5451_s1 = inlined_call_operand.vmem [shape: bf16[64,256], index: 1, kind: input, shape index: {}]   ;;  %s5452_s2 = inlined_call_operand.vmem [shape: bf16[256,64], index: 2, kind: input, shape index: {}]   ;;  %s5453_s3 = inlined_call_operand.hbm [shape: bf16[128,1024], index: 3, kind: input, shape index: {}]   ;;  %s5454_s4 = inlined_call_operand.vmem [shape: f32[1,1024], index: 4, kind: input, shape index: {}]   ;;  %s5455_s5 = inlined_call_operand.hbm [shape: f32[64,1024], index: 5, kind: input, shape index: {}]   ;;  %s5456_s6 = inlined_call_operand.hbm [shape: bf16[1024,128], index: 6, kind: input, shape index: {}]   ;;  %s5457_s7 = inlined_call_operand.vmem [shape: bf16[128,128], index: 7, kind: input, shape index: {}]   ;;  %s5458_s8 = inlined_call_operand.vmem [shape: f32[1,128], index: 8, kind: input, shape index: {}]   ;;  %s5459_s9 = inlined_call_operand.hbm [shape: bf16[2,256,128], index: 9, kind: output, shape index: {}]  }
   0x1   :  { %5466 = sst [smem:[#allocation15_spill]] %s5453_s3 }
   0x2   :  { %5467 = sst [smem:[#allocation16_spill]] %s5455_s5 }
   0x3   :  { %5468 = sst [smem:[#allocation17_spill]] %s5456_s6 }
   0x4   :  { %14 = vsyncpa [#allocation3], 0 }
   0x5   :  { %16 = vsyncpa [#allocation3 + $0x1], 0 }
   0x6   :  { %17 = vsyncpa [#allocation6], 0 }
   0x7   :  { %18 = vsyncpa [#allocation9], 0 }
   0x8   :  { %19 = vsyncpa [#allocation4], 0 }
   0x9   :  { %21 = vsyncpa [#allocation4 + $0x1], 0  ;;  %s4523_s30 = smov 0   ;;  %s4525_s10 = smov 0  }
   0xa   :  { %s4527_s11 = smov 0   ;;  %s4529_s12 = smov 0  }
   0xb LB: > { %s4544_s13 = sadd.s32 4294967295, %s4458_s12   ;;  %s3349_s14 = sadd.s32 4294967294, %s4458_s12   ;;  %s4458_s12 = sphi %s4529_s12, %s5493_s12   ;;  %s4454_s11 = sphi %s4527_s11, %s5492_s11   ;;  %s4450_s10 = sphi %s4525_s10, %s5491_s10   ;;  %s4446_s30 = sphi %s4523_s30, %s5490_s30  }
   0xc   : > { %p47_p0 = scmp.ne.s32.totalorder %s4450_s10, %s4446_s30  ;;  %p5460_p1 = scmp.eq.s32.totalorder %s4544_s13, 0 }
   0xd   : > { %p245_p3 = scmp.eq.s32.totalorder %s3349_s14, 1  ;;  %p3350_p5 = scmp.ge.s32.totalorder %s4458_s12, 1 }
   0xe   : > { %p4553_p4 = por %p5460_p1, %p47_p0  ;;  %p252_p7 = scmp.lt.s32.totalorder %s4458_s12, 3 }
   0xf   : > { %p4558_p6 = por %p245_p3, %p47_p0  ;;  %s4460_s18 = smov [#allocation5]  }
  0x10   : > { %s5469_s15 = scalar_select %p4553_p4, 1, 0 }
  0x11   : > { %s5470_s16 = scalar_select %p4558_p6, 1, 0 }
  0x12   : > { %p4563_p8 = pnand %p3350_p5, %p252_p7  ;;  %s270_s19 = sshll.u32 %s4460_s18, 4  ;;  %s271_s19 = int_to_ptr.vmem [resolvable:$true] %s270_s19 }
  0x13   : > { %s4461_s21 = smov [#allocation7]   ;;  %s4291_s23 = scalar_lea.vmem %s271_s19, 8192 }
  0x14   : > { %s5471_s17 = scalar_select %p4563_p8, 1, 0 }
  0x15   : > { %p4079_p9 = pneg %p4563_p8  ;;  %s286_s22 = sshll.u32 %s4461_s21, 4  ;;  %s287_s22 = int_to_ptr.vmem [resolvable:$true] %s286_s22 }
  0x16   : > { %p4292_p13 = scmp.ne.s32.totalorder %s271_s19, %s4291_s23  ;;  %p4299_p5 = scmp.lt.s32.totalorder %s271_s19, %s271_s19 }
  0x17   : > { %p4572_p11 = pnand %p4079_p9, %p5460_p1  ;;  %p4300_p7 = scmp.lt.s32.totalorder %s4291_s23, %s4291_s23 }
  0x19   : > { %p4282_p12 = pneg %p4572_p11  ;;  %p4301_p10 = por %p4300_p7, %p4299_p5 }
  0x1b   : > { %p4294_p0 = pnand %p4292_p13, %p4282_p12 }
  0x1d   : > { %p4295_p3 = pneg %p4294_p0 }
  0x1f   : > { %p4302_p9 = pnand %p4301_p10, %p4295_p3 }
  0x21   : > { %4305 = shalt.err (!%p4302_p9)
}
  0x22   : > { %s4462_s24 = smov 512   ;;  %s4463_s25 = smov 32  }
  0x23   : > { %s5473_s3 = sld [smem:[#allocation15_spill]]  ;;  %s4317_s28 = scalar_lea.vmem %s287_s22, 8192 }
  0x24   : > { %p4318_p1 = scmp.ne.s32.totalorder %s287_s22, %s4317_s28  ;;  %p4325_p2 = scmp.lt.s32.totalorder %s287_s22, %s287_s22 }
  0x25   : > { %p4326_p6 = scmp.lt.s32.totalorder %s4317_s28, %s4317_s28 }
  0x26   : > { %p4320_p13 = pnand %p4318_p1, %p4282_p12 }
  0x27   : > { %p4327_p5 = por %p4326_p6, %p4325_p2 }
  0x28   : > { %p4321_p0 = pneg %p4320_p13 }
  0x29   : > { %4082 = dma.hbm_to_vmem [thread:$0]  (!%p4572_p11), %s5473_s3, 8192, %s271_s19, [#allocation6], %s4462_s24, %s4462_s24, %s4463_s25  }
  0x2a   : > { %p4328_p10 = pnand %p4327_p5, %p4321_p0 }
  0x2c   : > { %4331 = shalt.err (!%p4328_p10)
}
  0x2d   : > { %s4464_s29 = smov 1024   ;;  %s5461_s14 = smov 64  }
  0x2e   : > { %s5474_s5 = sld [smem:[#allocation16_spill]]  ;;  %s4466_s19 = smov [#allocation8]  }
  0x2f   : > { %s299_s23 = sshll.u32 %s4466_s19, 4  ;;  %s300_s23 = int_to_ptr.vmem [resolvable:$true] %s299_s23 }
  0x30   : > { %s4343_s24 = scalar_lea.vmem %s300_s23, 8192  ;;  %p4351_p3 = scmp.lt.s32.totalorder %s300_s23, %s300_s23 }
  0x31   : > { %p4344_p1 = scmp.ne.s32.totalorder %s300_s23, %s4343_s24  ;;  %p4352_p7 = scmp.lt.s32.totalorder %s4343_s24, %s4343_s24 }
  0x33   : > { %p4346_p2 = pnand %p4344_p1, %p4282_p12  ;;  %p4353_p9 = por %p4352_p7, %p4351_p3 }
  0x34   : > { %4085 = dma.hbm_to_vmem [thread:$0]  (!%p4572_p11), %s5474_s5, 8192, %s287_s22, [#allocation6], %s4464_s29, %s4464_s29, %s5461_s14  }
  0x35   : > { %p4347_p6 = pneg %p4346_p2 }
  0x37   : > { %p4354_p13 = pnand %p4353_p9, %p4347_p6 }
  0x39   : > { %4357 = shalt.err (!%p4354_p13)
}
  0x3a   : > { %s5462_s25 = smov 4   ;;  %s5475_s6 = sld [smem:[#allocation17_spill]] }
  0x3b   : > { %s4607_s27 = sadd.s32 1, %s4458_s12   ;;  %s34_s20 = sadd.s32 1, %s4454_s11 }
  0x3c   : > { %s31_s28 = ssub.s32 %s4458_s12, %s4607_s27  ;;  %p41_p12 = scmp.ne.s32.totalorder %s4454_s11, %s4450_s10 }
  0x3d   : > { %p32_p0 = scmp.eq.s32.totalorder %s31_s28, 0  ;;  %p42_p5 = scmp.eq.s32.totalorder %s4458_s12, 0 }
  0x3e   : > { %p5476_p10 = scmp.eq.s32.totalorder %s4544_s13, 1  ;;  %p4100_p2 = scmp.lt.s32.totalorder %s4458_s12, 2 }
  0x3f   : > { %s4623_s18 = scalar_select %p32_p0, %s4454_s11, %s34_s20  }
  0x40   : > { %4088 = dma.hbm_to_vmem [thread:$0]  (!%p4572_p11), %s5475_s6, 8192, %s300_s23, [#allocation9], %s5461_s14, %s5461_s14, %s5462_s25  }
  0x41   : > { %p4617_p1 = por %p5476_p10, %p41_p12  ;;  %p43_p6 = por %p42_p5, %p41_p12 }
  0x42   : > { %s319_s21 = sand.u32 1, %s4454_s11   ;;  %s3594_s23 = sshll.u32 %s4458_s12, 11 }
  0x43   : > { %s5477_s29 = scalar_select %p4617_p1, 1, 0 }
  0x44   : > { %s3355_s19 = sshll.u32 %s319_s21, 7  ;;  %s4630_s26 = scalar_lea.hbm %s5450_s0, %s3594_s23 }
  0x45   : > { %s323_s28 = scalar_lea.vmem [#allocation2], %s3355_s19  ;;  %p4634_p11 = pnand %p4100_p2, %p43_p6 }
  0x46   : > { %s330_s14 = sshll.u32 %s323_s28, 4  ;;  %s4638_s20 = scalar_lea.sflag [#allocation3], %s319_s21  ;;  %s4632_s14 = int_to_ptr.vmem [resolvable:$true] %s330_s14 }
  0x47   : > { %s4358_s3 = scalar_lea.hbm %s4630_s26, 2048  ;;  %p4360_p7 = pneg %p4634_p11 }
  0x48   : > { %p4359_p3 = scmp.ne.s32.totalorder %s4630_s26, %s4358_s3  ;;  %s4363_s19 = scalar_lea.hbm %s5450_s0, 4096 }
  0x49   : > { %p4364_p12 = scmp.lt.s32.totalorder %s4630_s26, %s5450_s0  ;;  %p4365_p0 = scmp.lt.s32.totalorder %s4363_s19, %s4358_s3 }
  0x4a   : > { %p4361_p9 = pnand %p4360_p7, %p4359_p3 }
  0x4b   : > { %p4366_p5 = por %p4365_p0, %p4364_p12 }
  0x4c   : > { %p4362_p13 = pneg %p4361_p9 }
  0x4e   : > { %p4367_p10 = pnand %p4366_p5, %p4362_p13 }
  0x50   : > { %4370 = shalt.err (!%p4367_p10)
}
  0x51   : > { %s4371_s21 = scalar_lea.vmem %s4632_s14, 2048  ;;  %s4468_s5 = smov [#allocation2]  }
  0x52   : > { %p4372_p2 = scmp.ne.s32.totalorder %s4632_s14, %s4371_s21  ;;  %s4376_s6 = sshll.u32 %s4468_s5, 4  ;;  %s4377_s6 = int_to_ptr.vmem [resolvable:$false] %s4376_s6 }
  0x53   : > { %s4378_s23 = scalar_lea.vmem %s4377_s6, 4096  ;;  %p4379_p9 = scmp.lt.s32.totalorder %s4632_s14, %s4377_s6 }
  0x54   : > { %p4374_p6 = pnand %p4372_p2, %p4360_p7  ;;  %p4380_p1 = scmp.lt.s32.totalorder %s4378_s23, %s4371_s21 }
  0x56   : > { %p4375_p3 = pneg %p4374_p6  ;;  %p4381_p4 = por %p4380_p1, %p4379_p9 }
  0x58   : > { %p4382_p8 = pnand %p4381_p4, %p4375_p3 }
  0x5a   : > { %4385 = shalt.err (!%p4382_p8)
}
  0x5b   : > { %s5479_s3 = smov 4   ;;  %s5480_s24 = smov 64  }
  0x5c   : > { %4092 = dma.hbm_to_vmem [thread:$0]  (!%p4634_p11), %s4630_s26, 2048, %s4632_s14, %s4638_s20, %s5480_s24, %s5480_s24, %s5479_s3  }
  0x5d   : > { %p5481_p7 = scmp.ne.s32.totalorder %s5471_s17, 0 }
  0x5e   : > { %s4665_s5 = sand.u32 (!%p5481_p7), 1, %s4450_s10   ;;  %p5482_p4 = scmp.ne.s32.totalorder (!%p5481_p7), %s5469_s15, 0 }
  0x5f   : > { %342 = sbr.rel (%p5481_p7) target bundleno = 1113 (0x459), region = 56  ;;  %s3359_s6 = sshll.u32 (!%p5481_p7), %s4665_s5, 7 }
  0x60   : > { %s345_s19 = scalar_lea.sflag (!%p5481_p7), [#allocation3], %s4665_s5  ;;  %s4671_s25 = scalar_lea.vmem (!%p5481_p7), [#allocation2], %s3359_s6 }
  0x64   : > { %4429 = dma.done.wait (%p5482_p4), %s345_s19, 2048  }
  0x65   : > { %4431 = vsyncadd (%p5482_p4), %s345_s19, 4294965248  ;;  %p5483_p8 = scmp.eq.s32.totalorder %s4544_s13, 0 }
  0x67   : > { %4433 = dma.done.wait (%p5483_p8), [#allocation6], 16384   ;;  %p5484_p1 = pmov %p5483_p8 }
  0x69   : > { %4435 = vsyncadd (%p5484_p1), [#allocation6], 4294950912  ;;  %p5485_p11 = pmov %p5484_p1 }
  0x6a   : > { %p5486_p13 = pmov %p5484_p1 }
  0x6b   : > { %4437 = dma.done.wait (%p5485_p11), [#allocation9], 8192  }
  0x6c   : > { %4439 = vsyncadd (%p5486_p13), [#allocation9], 4294959104  ;;  %v4148_v0 = vld [vmem:[%s4671_s25 + $0x78] sm:$0xff]   ;;  %v4150_v2 = vld [vmem:[%s4671_s25 + $0x70] sm:$0xff]   ;;  %s5339_s22 = scalar_lea.vmem [#allocation10], %s3359_s6  ;;  %s3627_s6 = sshll.u32 %s4544_s13, 11 }
  0x6d   : > { %v4149_v1 = vld [vmem:[%s4671_s25 + $0x38] sm:$0xff]   ;;  %3723 = vmatprep.subr.bf16.mxu0 %v4148_v0  ;;  %v4151_v3 = vld [vmem:[%s4671_s25 + $0x30] sm:$0xff]   ;;  %v4152_v4 = vld [vmem:[%s4671_s25 + $0x68] sm:$0xff]   ;;  %s3247_s28 = sshll.u32 %s5339_s22, 4  ;;  %s5403_s3 = scalar_lea.hbm %s5459_s9, %s3627_s6  ;;  %s5405_s28 = int_to_ptr.vmem [resolvable:$true] %s3247_s28 }
  0x6e   : > { %3724 = vmatpush3.bf16.msra.mxu0 %v4149_v1  ;;  %v4153_v5 = vld [vmem:[%s4671_s25 + $0x28] sm:$0xff]   ;;  %v4154_v6 = vld [vmem:[%s4671_s25 + $0x60] sm:$0xff]   ;;  %v4156_v8 = vld [vmem:[%s4671_s25 + $0x58] sm:$0xff]   ;;  %s3234_s24 = scalar_lea.sflag [#allocation4], %s4665_s5  ;;  %s4386_s13 = scalar_lea.vmem %s5405_s28, 2048 }
  0x6f   : > { %3725 = vmatprep.subr.bf16.mxu0 %v4150_v2  ;;  %v4155_v7 = vld [vmem:[%s4671_s25 + $0x20] sm:$0xff]   ;;  %v4157_v9 = vld [vmem:[%s4671_s25 + $0x18] sm:$0xff]   ;;  %v4158_v10 = vld [vmem:[%s4671_s25 + $0x50] sm:$0xff]   ;;  %p4387_p12 = scmp.ne.s32.totalorder %s5405_s28, %s4386_s13  ;;  %p5487_p0 = scmp.ne.s32.totalorder %s5477_s29, 0 }
  0x70   : > { %v4166_v11 = vld [vmem:[%s5451_s1 + $0x4] ss:$8 sps:$4 sm:$0xff]   ;;  %v4159_v12 = vld [vmem:[%s4671_s25 + $0x10] sm:$0xff]   ;;  %v4164_v32 = vld [vmem:[%s5451_s1] ss:$8 sps:$4 sm:$0xff]   ;;  %s4470_s19 = smov [#allocation10]  }
  0x71   : > { %604 = vmatprep.mubr.bf16.mxu0 %v4166_v11  ;;  %v4160_v13 = vld [vmem:[%s4671_s25 + $0x48] sm:$0xff]   ;;  %v697_v14 = vld [vmem:[#allocation5 + $0x1c0] sm:$0xff]  ;;  %v4167_v36 = vld [vmem:[%s5451_s1 + $0x14] ss:$8 sps:$4 sm:$0xff]   ;;  %p4388_p5 = pnand %p4387_p12, %p5487_p0  ;;  %s4390_s15 = sshll.u32 %s4470_s19, 4  ;;  %s4391_s15 = int_to_ptr.vmem [resolvable:$false] %s4390_s15 }
  0x72   : > { %3726 = vmatpush3.bf16.msra.mxu0 %v4151_v3  ;;  %v701_v15 = vld [vmem:[#allocation5 + $0x1e0] sm:$0xff]  ;;  %v4161_v19 = vld [vmem:[%s4671_s25 + $0x8] sm:$0xff]   ;;  %v4169_v52 = vld [vmem:[%s5451_s1 + $0x10] ss:$8 sps:$4 sm:$0xff]   ;;  %s4392_s17 = scalar_lea.vmem %s4391_s15, 4096  ;;  %p4393_p2 = scmp.lt.s32.totalorder %s5405_s28, %s4391_s15 }
  0x73   : > { %3727 = vmatprep.subr.bf16.mxu0 %v4152_v4  ;;  %v3445_v16 = vcombine.high %v697_v14, %v701_v15  ;;  %v3444_v17 = vcombine.low %v697_v14, %v701_v15  ;;  %v689_v18 = vld [vmem:[#allocation5 + $0x180] sm:$0xff]  ;;  %v698_v25 = vld [vmem:[#allocation5 + $0x1c8] sm:$0xff]  ;;  %v4173_v2 = vld [vmem:[%s5451_s1 + $0x34] ss:$8 sps:$4 sm:$0xff]   ;;  %p4389_p10 = pneg %p4388_p5  ;;  %p4394_p6 = scmp.lt.s32.totalorder %s4392_s17, %s4386_s13 }
  0x74   : > { %v693_v20 = vld [vmem:[#allocation5 + $0x1a0] sm:$0xff]  ;;  %v702_v26 = vld [vmem:[#allocation5 + $0x1e8] sm:$0xff] }
  0x75   : > { %v4162_v21 = vld [vmem:[%s4671_s25 + $0x40] sm:$0xff]   ;;  %1067 = vmatprep.subr.bf16.mxu1 %v3445_v16  ;;  %v3437_v22 = vcombine.high %v689_v18, %v693_v20  ;;  %v3436_v27 = vcombine.low %v689_v18, %v693_v20  ;;  %v3447_v33 = vcombine.high %v698_v25, %v702_v26  ;;  %v690_v34 = vld [vmem:[#allocation5 + $0x188] sm:$0xff]  ;;  %v3446_v41 = vcombine.low %v698_v25, %v702_v26  ;;  %v703_v25 = vld [vmem:[#allocation5 + $0x1f0] sm:$0xff]  ;;  %p4395_p3 = por %p4394_p6, %p4393_p2 }
  0x76   : > { %3728 = vmatpush3.bf16.msra.mxu0 %v4153_v5  ;;  %v681_v23 = vld [vmem:[#allocation5 + $0x140] sm:$0xff]  ;;  %1068 = vmatpush1.bf16.msra.mxu1 %v3444_v17  ;;  %v694_v35 = vld [vmem:[#allocation5 + $0x1a8] sm:$0xff]  ;;  %v700_v26 = vld [vmem:[#allocation5 + $0x1d8] sm:$0xff] }
  0x77   : > { %3729 = vmatprep.subr.bf16.mxu0 %v4154_v6  ;;  %v685_v24 = vld [vmem:[#allocation5 + $0x160] sm:$0xff]  ;;  %1069 = vmatprep.subr.bf16.mxu1 %v3437_v22  ;;  %v682_v42 = vld [vmem:[#allocation5 + $0x148] sm:$0xff]  ;;  %v3439_v44 = vcombine.high %v690_v34, %v694_v35  ;;  %v3438_v49 = vcombine.low %v690_v34, %v694_v35  ;;  %v4175_v6 = vld [vmem:[%s5451_s1 + $0x30] ss:$8 sps:$4 sm:$0xff]   ;;  %p4396_p9 = pnand %p4395_p3, %p4389_p10 }
  0x78   : > { %v3429_v28 = vcombine.high %v681_v23, %v685_v24  ;;  %v4163_v29 = vld [vmem:[%s4671_s25] sm:$0xff]   ;;  %v3428_v37 = vcombine.low %v681_v23, %v685_v24  ;;  %v686_v43 = vld [vmem:[#allocation5 + $0x168] sm:$0xff]  ;;  %v699_v24 = vld [vmem:[#allocation5 + $0x1d0] sm:$0xff] }
  0x79   : > { %v673_v30 = vld [vmem:[#allocation5 + $0x100] sm:$0xff]  ;;  %v674_v50 = vld [vmem:[#allocation5 + $0x108] sm:$0xff]  ;;  %v3431_v53 = vcombine.high %v682_v42, %v686_v43  ;;  %v3430_v57 = vcombine.low %v682_v42, %v686_v43 }
  0x7a   : > { %3730 = vmatpush3.bf16.msra.mxu0 %v4155_v7  ;;  %v677_v31 = vld [vmem:[#allocation5 + $0x120] sm:$0xff]  ;;  %1070 = vmatpush1.bf16.msra.mxu1 %v3436_v27  ;;  %v678_v51 = vld [vmem:[#allocation5 + $0x128] sm:$0xff]  ;;  %v3449_v27 = vcombine.high %v699_v24, %v703_v25 }
  0x7b   : > { %3731 = vmatprep.subr.bf16.mxu0 %v4156_v8  ;;  %v665_v38 = vld [vmem:[#allocation5 + $0xc0] sm:$0xff]  ;;  %1071 = vmatprep.subr.bf16.mxu1 %v3429_v28  ;;  %v3421_v40 = vcombine.high %v673_v30, %v677_v31  ;;  %v3420_v45 = vcombine.low %v673_v30, %v677_v31  ;;  %v666_v58 = vld [vmem:[#allocation5 + $0xc8] sm:$0xff]  ;;  %v3423_v60 = vcombine.high %v674_v50, %v678_v51  ;;  %v704_v28 = vld [vmem:[#allocation5 + $0x1f8] sm:$0xff] }
  0x7c   : > { %v669_v39 = vld [vmem:[#allocation5 + $0xe0] sm:$0xff]  ;;  %v670_v59 = vld [vmem:[#allocation5 + $0xe8] sm:$0xff]  ;;  %v3422_v61 = vcombine.low %v674_v50, %v678_v51  ;;  %v3448_v30 = vcombine.low %v699_v24, %v703_v25  ;;  %v3450_v31 = vcombine.low %v700_v26, %v704_v28  ;;  %v684_v50 = vld [vmem:[#allocation5 + $0x158] sm:$0xff] }
  0x7d   : > { %v657_v46 = vld [vmem:[#allocation5 + $0x80] sm:$0xff]  ;;  %v3413_v48 = vcombine.high %v665_v38, %v669_v39  ;;  %v3412_v55 = vcombine.low %v665_v38, %v669_v39  ;;  %v658_v62 = vld [vmem:[#allocation5 + $0x88] sm:$0xff]  ;;  %v3415_v1 = vcombine.high %v666_v58, %v670_v59  ;;  %v3414_v3 = vcombine.low %v666_v58, %v670_v59  ;;  %v695_v38 = vld [vmem:[#allocation5 + $0x1b0] sm:$0xff] }
  0x7e   : > { %3732 = vmatpush3.bf16.msra.mxu0 %v4157_v9  ;;  %1072 = vmatpush1.bf16.msra.mxu1 %v3428_v37  ;;  %v661_v47 = vld [vmem:[#allocation5 + $0xa0] sm:$0xff]  ;;  %v662_v63 = vld [vmem:[#allocation5 + $0xa8] sm:$0xff]  ;;  %v692_v39 = vld [vmem:[#allocation5 + $0x198] sm:$0xff] }
  0x7f   : > { %3733 = vmatprep.subr.bf16.mxu0 %v4158_v10  ;;  %1073 = vmatprep.subr.bf16.mxu1 %v3421_v40  ;;  %v4170_v54 = vld [vmem:[%s5451_s1 + $0x24] ss:$8 sps:$4 sm:$0xff]   ;;  %v3405_v56 = vcombine.high %v657_v46, %v661_v47  ;;  %v4172_v0 = vld [vmem:[%s5451_s1 + $0x20] ss:$8 sps:$4 sm:$0xff]   ;;  %v3407_v4 = vcombine.high %v658_v62, %v662_v63  ;;  %v3406_v5 = vcombine.low %v658_v62, %v662_v63  ;;  %v696_v40 = vld [vmem:[#allocation5 + $0x1b8] sm:$0xff] }
  0x80   : > { %v3404_v7 = vcombine.low %v657_v46, %v661_v47  ;;  %v649_v8 = vld [vmem:[#allocation5 + $0x40] sm:$0xff]  ;;  %v650_v10 = vld [vmem:[#allocation5 + $0x48] sm:$0xff]  ;;  %v3443_v46 = vcombine.high %v692_v39, %v696_v40  ;;  %v683_v47 = vld [vmem:[#allocation5 + $0x150] sm:$0xff] }
  0x81   : > { %v653_v9 = vld [vmem:[#allocation5 + $0x60] sm:$0xff]  ;;  %v642_v18 = vld [vmem:[#allocation5 + $0x8] sm:$0xff]  ;;  %v688_v51 = vld [vmem:[#allocation5 + $0x178] sm:$0xff] }
  0x82   : > { %3734 = vmatpush3.bf16.msra.mxu0 %v4159_v12  ;;  %1074 = vmatpush1.bf16.msra.mxu1 %v3420_v45  ;;  %v3397_v11 = vcombine.high %v649_v8, %v653_v9  ;;  %v654_v12 = vld [vmem:[#allocation5 + $0x68] sm:$0xff]  ;;  %v3396_v15 = vcombine.low %v649_v8, %v653_v9  ;;  %v641_v16 = vld [vmem:[#allocation5] sm:$0xff]  ;;  %v679_v59 = vld [vmem:[#allocation5 + $0x130] sm:$0xff] }
  0x83   : > { %3735 = vmatprep.subr.bf16.mxu0 %v4160_v13  ;;  %1075 = vmatprep.subr.bf16.mxu1 %v3413_v48  ;;  %v3398_v13 = vcombine.low %v650_v10, %v654_v12  ;;  %v3399_v14 = vcombine.high %v650_v10, %v654_v12  ;;  %v645_v17 = vld [vmem:[#allocation5 + $0x20] sm:$0xff]  ;;  %v646_v20 = vld [vmem:[#allocation5 + $0x28] sm:$0xff]  ;;  %v671_v8 = vld [vmem:[#allocation5 + $0xf0] sm:$0xff] }
  0x84   : > { %v3391_v22 = vcombine.high %v642_v18, %v646_v20  ;;  %v3388_v23 = vcombine.low %v641_v16, %v645_v17  ;;  %v668_v9 = vld [vmem:[#allocation5 + $0xd8] sm:$0xff] }
  0x85   : > { %v672_v10 = vld [vmem:[#allocation5 + $0xf8] sm:$0xff] }
  0x86   : > { %3736 = vmatpush3.bf16.msra.mxu0 %v4161_v19  ;;  %1076 = vmatpush1.bf16.msra.mxu1 %v3412_v55  ;;  %v3389_v19 = vcombine.high %v641_v16, %v645_v17  ;;  %v659_v16 = vld [vmem:[#allocation5 + $0x90] sm:$0xff]  ;;  %v3418_v25 = vcombine.low %v668_v9, %v672_v10 }
  0x87   : > { %3737 = vmatprep.subr.bf16.mxu0 %v4162_v21  ;;  %1077 = vmatprep.subr.bf16.mxu1 %v3405_v56  ;;  %v3390_v21 = vcombine.low %v642_v18, %v646_v20  ;;  %v3435_v56 = vcombine.high %v684_v50, %v688_v51  ;;  %v663_v18 = vld [vmem:[#allocation5 + $0xb0] sm:$0xff]  ;;  %v664_v20 = vld [vmem:[#allocation5 + $0xb8] sm:$0xff] }
  0x8a   : > { %3738 = vmatpush3.bf16.msra.mxu0 %v4163_v29  ;;  %1078 = vmatpush1.bf16.msra.mxu1 %v3404_v7  ;;  %v4469_v29 = vmov 0  }
  0x8b   : > { %1140 = vmatprep.subr.bf16.mxu0 %v3447_v33  ;;  %1079 = vmatprep.subr.bf16.mxu1 %v3397_v11 }
  0x8c   : > { %1099 = vmatprep.mubr.bf16.mxu1 %v4469_v29 }
  0x8d   : > { %605 = vmatmul.mubr.bf16.vlgmr.msra.gmra.mxu0 %v4164_v32  ;;  %v3451_v32 = vcombine.high %v700_v26, %v704_v28 }
  0x8e   : > { %612 = vmatprep.mubr.bf16.mxu0 %v4167_v36  ;;  %1141 = vmatpush1.bf16.msra.mxu0 %v3446_v41  ;;  %v691_v36 = vld [vmem:[#allocation5 + $0x190] sm:$0xff] }
  0x8f   : > { %1142 = vmatprep.subr.bf16.mxu0 %v3439_v44  ;;  %1080 = vmatpush1.bf16.msra.mxu1 %v3396_v15  ;;  %v3441_v45 = vcombine.high %v691_v36, %v695_v38  ;;  %v3419_v15 = vcombine.high %v668_v9, %v672_v10  ;;  %v4195_v9 = vld [vmem:[#allocation8 + $0x98] sm:$0xff]   ;;  %v4196_v10 = vld [vmem:[#allocation8 + $0x50] sm:$0xff]  }
  0x90   : > { %1081 = vmatprep.subr.bf16.mxu1 %v3389_v19  ;;  %v660_v19 = vld [vmem:[#allocation5 + $0x98] sm:$0xff] }
  0x91   : > { %v3411_v28 = vcombine.high %v660_v19, %v664_v20 }
  0x92   : > { %1143 = vmatpush1.bf16.msra.mxu0 %v3438_v49  ;;  %v687_v49 = vld [vmem:[#allocation5 + $0x170] sm:$0xff] }
  0x93   : > { %1144 = vmatprep.subr.bf16.mxu0 %v3431_v53  ;;  %1082 = vmatpush1.bf16.msra.mxu1 %v3388_v23  ;;  %v3440_v53 = vcombine.low %v691_v36, %v695_v38  ;;  %v3433_v55 = vcombine.high %v683_v47, %v687_v49  ;;  %v3408_v36 = vcombine.low %v659_v16, %v663_v18 }
  0x94   : > { %1213 = vmatprep.subr.bf16.mxu1 %v3449_v27  ;;  %v3409_v27 = vcombine.high %v659_v16, %v663_v18  ;;  %v4203_v16 = vld [vmem:[#allocation8 + $0x88] sm:$0xff]   ;;  %v4205_v18 = vld [vmem:[#allocation8 + $0xc0] sm:$0xff]  }
  0x95   : > { %613 = vmatmul.mubr.bf16.gmra.mxu0 %v4169_v52 }
  0x96   : > { %620 = vmatprep.mubr.bf16.mxu0 %v4170_v54  ;;  %1145 = vmatpush1.bf16.msra.mxu0 %v3430_v57  ;;  %v3442_v54 = vcombine.low %v692_v39, %v696_v40  ;;  %v675_v57 = vld [vmem:[#allocation5 + $0x110] sm:$0xff] }
  0x97   : > { %1146 = vmatprep.subr.bf16.mxu0 %v3423_v60  ;;  %v676_v60 = vld [vmem:[#allocation5 + $0x118] sm:$0xff]  ;;  %v3424_v12 = vcombine.low %v675_v57, %v679_v59  ;;  %v643_v40 = vld [vmem:[#allocation5 + $0x10] sm:$0xff] }
  0x9a   : > { %1147 = vmatpush1.bf16.msra.mxu0 %v3422_v61  ;;  %v680_v61 = vld [vmem:[#allocation5 + $0x138] sm:$0xff] }
  0x9b   : > { %1148 = vmatprep.subr.bf16.mxu0 %v3415_v1  ;;  %v3432_v1 = vcombine.low %v683_v47, %v687_v49 }
  0x9d   : > { %621 = vmatmul.mubr.bf16.gmra.mxu0 %v4172_v0 }
  0x9e   : > { %628 = vmatprep.mubr.bf16.mxu0 %v4173_v2  ;;  %1149 = vmatpush1.bf16.msra.mxu0 %v3414_v3  ;;  %v3434_v2 = vcombine.low %v684_v50, %v688_v51 }
  0x9f   : > { %1150 = vmatprep.subr.bf16.mxu0 %v3407_v4  ;;  %v3425_v4 = vcombine.high %v675_v57, %v679_v59  ;;  %v4178_v57 = vld [vmem:[#allocation8 + $0x38] sm:$0xff]   ;;  %v4180_v59 = vld [vmem:[#allocation8 + $0x70] sm:$0xff]  }
  0xa2   : > { %1151 = vmatpush1.bf16.msra.mxu0 %v3406_v5  ;;  %v3427_v5 = vcombine.high %v676_v60, %v680_v61 }
  0xa3   : > { %1152 = vmatprep.subr.bf16.mxu0 %v3399_v14 }
  0xa5   : > { %629 = vmatmul.mubr.bf16.gmra.mxu0 %v4175_v6  ;;  %v667_v6 = vld [vmem:[#allocation5 + $0xd0] sm:$0xff] }
  0xa6   : > { %1153 = vmatpush1.bf16.msra.mxu0 %v3398_v13  ;;  %1172 = vmatprep.mubr.bf16.mxu0 %v4469_v29  ;;  %v3426_v13 = vcombine.low %v676_v60, %v680_v61  ;;  %v3417_v14 = vcombine.high %v667_v6, %v671_v8  ;;  %v3416_v24 = vcombine.low %v667_v6, %v671_v8  ;;  %v4181_v60 = vld [vmem:[#allocation8 + $0xf0] sm:$0xff]   ;;  %v4191_v6 = vld [vmem:[#allocation8 + $0xa0] sm:$0xff]   ;;  %v4194_v8 = vld [vmem:[#allocation8 + $0x18] sm:$0xff]  }
  0xa7   : > { %1154 = vmatprep.subr.bf16.mxu0 %v3391_v22  ;;  %v4182_v61 = vld [vmem:[#allocation8 + $0x30] sm:$0xff]  }
  0xaa   : > { %1155 = vmatpush1.bf16.msra.mxu0 %v3390_v21 }
  0xab   : > { %1286 = vmatprep.subr.bf16.mxu0 %v3451_v32  ;;  %v655_v32 = vld [vmem:[#allocation5 + $0x70] sm:$0xff] }
 0x14d   : > { %v3739_v33 = vpop.f32.mrf.mxu0 }
 0x14f   : > { %v3740_v34 = vpop.f32.mrf.mxu0 }
 0x150   : > { %v3741_v41 = vadd.f32 %v3740_v34, %v3739_v33  ;;  %v652_v33 = vld [vmem:[#allocation5 + $0x58] sm:$0xff] }
 0x151   : > { %v3742_v35 = vpop.f32.mrf.mxu0  ;;  %v656_v34 = vld [vmem:[#allocation5 + $0x78] sm:$0xff] }
 0x152   : > { %v3403_v39 = vcombine.high %v652_v33, %v656_v34  ;;  %v3402_v49 = vcombine.low %v652_v33, %v656_v34 }
 0x153   : > { %v3743_v37 = vpop.f32.mrf.mxu0 }
 0x154   : > { %v3744_v42 = vadd.f32 %v3743_v37, %v3742_v35  ;;  %v3410_v37 = vcombine.low %v660_v19, %v664_v20  ;;  %v4206_v19 = vld [vmem:[#allocation8] sm:$0xff]  }
 0x155   : > { %v3745_v43 = vpop.f32.mrf.mxu0  ;;  %v4207_v20 = vld [vmem:[#allocation8 + $0x80] sm:$0xff]  }
 0x156   : > { %v4727_v44 = vpack.c.bf16 %v3744_v42, %v3741_v41  ;;  %v647_v42 = vld [vmem:[#allocation5 + $0x30] sm:$0xff] }
 0x157   : > { %v3746_v48 = vpop.f32.mrf.mxu0  ;;  %v3393_v51 = vcombine.high %v643_v40, %v647_v42 }
 0x158   : > { %1100 = vmatmul.mubr.bf16.vlgmr.msra.gmra.mxu1 %v4727_v44  ;;  %1173 = vmatmul.mubr.bf16.vlgmr.msra.gmra.mxu0 %v4727_v44  ;;  %v3747_v62 = vadd.f32 %v3746_v48, %v3745_v43  ;;  %v644_v43 = vld [vmem:[#allocation5 + $0x18] sm:$0xff] }
 0x159   : > { %v3748_v52 = vpop.f32.mrf.mxu0  ;;  %1214 = vmatpush1.bf16.msra.mxu1 %v3448_v30  ;;  %1287 = vmatpush1.bf16.msra.mxu0 %v3450_v31  ;;  %v651_v30 = vld [vmem:[#allocation5 + $0x50] sm:$0xff] }
 0x15a   : > { %1215 = vmatprep.subr.bf16.mxu1 %v3441_v45  ;;  %1288 = vmatprep.subr.bf16.mxu0 %v3443_v46  ;;  %v3401_v38 = vcombine.high %v651_v30, %v655_v32  ;;  %v648_v45 = vld [vmem:[#allocation5 + $0x38] sm:$0xff]  ;;  %v3400_v48 = vcombine.low %v651_v30, %v655_v32 }
 0x15b   : > { %v3749_v58 = vpop.f32.mrf.mxu0  ;;  %1109 = vmatprep.mubr.bf16.mxu1 %v4469_v29  ;;  %1182 = vmatprep.mubr.bf16.mxu0 %v4469_v29 }
 0x15c   : > { %v3750_v63 = vadd.f32 %v3749_v58, %v3748_v52  ;;  %v3395_v52 = vcombine.high %v644_v43, %v648_v45  ;;  %v4179_v58 = vld [vmem:[#allocation8 + $0xb8] sm:$0xff]  }
 0x15d   : > { %v3751_v0 = vpop.f32.mrf.mxu0  ;;  %1216 = vmatpush1.bf16.msra.mxu1 %v3440_v53  ;;  %1289 = vmatpush1.bf16.msra.mxu0 %v3442_v54  ;;  %v3392_v53 = vcombine.low %v643_v40, %v647_v42  ;;  %v3394_v54 = vcombine.low %v644_v43, %v648_v45 }
 0x15e   : > { %v4733_v3 = vpack.c.bf16 %v3750_v63, %v3747_v62  ;;  %1217 = vmatprep.subr.bf16.mxu1 %v3433_v55  ;;  %1290 = vmatprep.subr.bf16.mxu0 %v3435_v56  ;;  %v4176_v55 = vld [vmem:[#allocation8 + $0x78] sm:$0xff]   ;;  %v4183_v62 = vld [vmem:[#allocation8 + $0xb0] sm:$0xff]   ;;  %v4184_v63 = vld [vmem:[#allocation8 + $0x68] sm:$0xff]  }
 0x15f   : > { %v3752_v7 = vpop.f32.mrf.mxu0  ;;  %v4177_v56 = vld [vmem:[#allocation8 + $0xf8] sm:$0xff]  }
 0x160   : > { %1110 = vmatmul.mubr.bf16.gmra.mxu1 %v4733_v3  ;;  %1183 = vmatmul.mubr.bf16.gmra.mxu0 %v4733_v3  ;;  %v3753_v21 = vadd.f32 %v3752_v7, %v3751_v0  ;;  %v4185_v0 = vld [vmem:[#allocation8 + $0xe8] sm:$0xff]   ;;  %v4193_v7 = vld [vmem:[#allocation8 + $0xd8] sm:$0xff]  }
 0x161   : > { %v3754_v11 = vpop.f32.mrf.mxu0  ;;  %1218 = vmatpush1.bf16.msra.mxu1 %v3432_v1  ;;  %1291 = vmatpush1.bf16.msra.mxu0 %v3434_v2  ;;  %v4186_v1 = vld [vmem:[#allocation8 + $0x28] sm:$0xff]  }
 0x162   : > { %1219 = vmatprep.subr.bf16.mxu1 %v3425_v4  ;;  %1292 = vmatprep.subr.bf16.mxu0 %v3427_v5  ;;  %v4187_v2 = vld [vmem:[#allocation8 + $0xa8] sm:$0xff]   ;;  %v4188_v4 = vld [vmem:[#allocation8 + $0x60] sm:$0xff]  }
 0x163   : > { %v3755_v17 = vpop.f32.mrf.mxu0  ;;  %1119 = vmatprep.mubr.bf16.mxu1 %v4469_v29  ;;  %1192 = vmatprep.mubr.bf16.mxu0 %v4469_v29  ;;  %v4190_v5 = vld [vmem:[#allocation8 + $0x20] sm:$0xff]  }
 0x164   : > { %v3756_v22 = vadd.f32 %v3755_v17, %v3754_v11  ;;  %v4197_v11 = vld [vmem:[#allocation8 + $0xd0] sm:$0xff]   ;;  %v4204_v17 = vld [vmem:[#allocation8 + $0x40] sm:$0xff]  }
 0x165   : > { %v3757_v23 = vpop.f32.mrf.mxu0  ;;  %1220 = vmatpush1.bf16.msra.mxu1 %v3424_v12  ;;  %1293 = vmatpush1.bf16.msra.mxu0 %v3426_v13  ;;  %v4198_v12 = vld [vmem:[#allocation8 + $0x10] sm:$0xff]  }
 0x166   : > { %v4739_v26 = vpack.c.bf16 %v3756_v22, %v3753_v21  ;;  %1221 = vmatprep.subr.bf16.mxu1 %v3417_v14  ;;  %1294 = vmatprep.subr.bf16.mxu0 %v3419_v15  ;;  %v4199_v13 = vld [vmem:[#allocation8 + $0x90] sm:$0xff]   ;;  %v4200_v14 = vld [vmem:[#allocation8 + $0x48] sm:$0xff]   ;;  %v4208_v21 = vld [vmem:[#allocation8 + $0x178] sm:$0xff]  }
 0x167   : > { %v3758_v31 = vpop.f32.mrf.mxu0  ;;  %v4202_v15 = vld [vmem:[#allocation8 + $0x8] sm:$0xff]   ;;  %v4209_v22 = vld [vmem:[#allocation8 + $0x1f8] sm:$0xff]  }
 0x168   : > { %1120 = vmatmul.mubr.bf16.gmra.mxu1 %v4739_v26  ;;  %1193 = vmatmul.mubr.bf16.gmra.mxu0 %v4739_v26  ;;  %v3759_v46 = vadd.f32 %v3758_v31, %v3757_v23  ;;  %v707_v23 = vlaneseq }
 0x169   : > { %v3760_v35 = vpop.f32.mrf.mxu0  ;;  %1222 = vmatpush1.bf16.msra.mxu1 %v3416_v24  ;;  %1295 = vmatpush1.bf16.msra.mxu0 %v3418_v25 }
 0x16a   : > { %1223 = vmatprep.subr.bf16.mxu1 %v3409_v27  ;;  %1296 = vmatprep.subr.bf16.mxu0 %v3411_v28  ;;  %v708_v24 = vshrl.u32 %v707_v23, 7  ;;  %v705_v27 = vld [vmem:[%s5454_s4] sm:$0xff] }
 0x16b   : > { %v3761_v41 = vpop.f32.mrf.mxu0  ;;  %1129 = vmatprep.mubr.bf16.mxu1 %v4469_v29  ;;  %1202 = vmatprep.mubr.bf16.mxu0 %v4469_v29 }
 0x16c   : > { %v3762_v47 = vadd.f32 %v3761_v41, %v3760_v35  ;;  %v709_v25 = vsub.s32 0, %v708_v24  ;;  %v713_v31 = vsub.s32 1, %v708_v24  ;;  %v721_v32 = vsub.s32 3, %v708_v24 }
 0x16d   : > { %1224 = vmatpush1.bf16.msra.mxu1 %v3408_v36  ;;  %1297 = vmatpush1.bf16.msra.mxu0 %v3410_v37  ;;  %v725_v40 = vsub.s32 4, %v708_v24  ;;  %v733_v41 = vsub.s32 6, %v708_v24 }
 0x16e   : > { %v640_v50 = vpack.c.bf16 %v3762_v47, %v3759_v46  ;;  %1225 = vmatprep.subr.bf16.mxu1 %v3401_v38  ;;  %1298 = vmatprep.subr.bf16.mxu0 %v3403_v39  ;;  %v4762_v28 = vrot.slane %v705_v27, %v709_v25  ;;  %v4768_v37 = vrot.slane %v705_v27, %v713_v31 }
 0x16f   : > { %v4770_v45 = vrot.slane %v705_v27, %v721_v32 }
 0x170   : > { %1130 = vmatmul.mubr.bf16.gmra.mxu1 %v640_v50  ;;  %1203 = vmatmul.mubr.bf16.gmra.mxu0 %v640_v50 }
 0x171   : > { %1226 = vmatpush1.bf16.msra.mxu1 %v3400_v48  ;;  %1299 = vmatpush1.bf16.msra.mxu0 %v3402_v49  ;;  %v729_v48 = vsub.s32 5, %v708_v24 }
 0x172   : > { %1227 = vmatprep.subr.bf16.mxu1 %v3393_v51  ;;  %1300 = vmatprep.subr.bf16.mxu0 %v3395_v52  ;;  %v737_v51 = vsub.s32 7, %v708_v24 }
 0x173   : > { %1245 = vmatprep.mubr.bf16.mxu1 %v4469_v29  ;;  %1318 = vmatprep.mubr.bf16.mxu0 %v4469_v29 }
 0x175   : > { %1228 = vmatpush1.bf16.msra.mxu1 %v3392_v53  ;;  %1301 = vmatpush1.bf16.msra.mxu0 %v3394_v54  ;;  %v1551_v53 = vld [vmem:[#allocation7] sm:$0xff] }
 0x176   : > { %3763 = vmatprep.subr.bf16.mxu1 %v4176_v55  ;;  %3803 = vmatprep.subr.bf16.mxu0 %v4177_v56 }
 0x178   : > { %1246 = vmatmul.mubr.bf16.vlgmr.msra.gmra.mxu1 %v4727_v44  ;;  %1319 = vmatmul.mubr.bf16.vlgmr.msra.gmra.mxu0 %v4727_v44  ;;  %v4189_v44 = vld [vmem:[#allocation8 + $0xe0] sm:$0xff]  }
 0x179   : > { %1255 = vmatprep.mubr.bf16.mxu1 %v4469_v29  ;;  %1328 = vmatprep.mubr.bf16.mxu0 %v4469_v29 }
 0x17a   : > { %3764 = vmatpush3.bf16.msra.mxu1 %v4178_v57  ;;  %3804 = vmatpush3.bf16.msra.mxu0 %v4179_v58  ;;  %v4775_v57 = vrot.slane %v705_v27, %v725_v40  ;;  %v4777_v58 = vrot.slane %v705_v27, %v733_v41 }
 0x17b   : > { %3765 = vmatprep.subr.bf16.mxu1 %v4180_v59  ;;  %3805 = vmatprep.subr.bf16.mxu0 %v4181_v60  ;;  %v1553_v60 = vld [vmem:[#allocation7 + $0x10] sm:$0xff] }
 0x17e   : > { %3766 = vmatpush3.bf16.msra.mxu1 %v4182_v61  ;;  %3806 = vmatpush3.bf16.msra.mxu0 %v4183_v62 }
 0x17f   : > { %3767 = vmatprep.subr.bf16.mxu1 %v4184_v63  ;;  %3807 = vmatprep.subr.bf16.mxu0 %v4185_v0  ;;  %v1559_v63 = vld [vmem:[#allocation7 + $0x40] sm:$0xff] }
 0x180   : > { %1256 = vmatmul.mubr.bf16.gmra.mxu1 %v4733_v3  ;;  %1329 = vmatmul.mubr.bf16.gmra.mxu0 %v4733_v3  ;;  %v4192_v3 = vld [vmem:[#allocation8 + $0x58] sm:$0xff]  }
 0x181   : > { %1265 = vmatprep.mubr.bf16.mxu1 %v4469_v29  ;;  %1338 = vmatprep.mubr.bf16.mxu0 %v4469_v29 }
 0x182   : > { %3768 = vmatpush3.bf16.msra.mxu1 %v4186_v1  ;;  %3808 = vmatpush3.bf16.msra.mxu0 %v4187_v2 }
 0x183   : > { %3769 = vmatprep.subr.bf16.mxu1 %v4188_v4  ;;  %3809 = vmatprep.subr.bf16.mxu0 %v4189_v44  ;;  %v4781_v44 = vrot.slane %v705_v27, %v729_v48 }
 0x186   : > { %3770 = vmatpush3.bf16.msra.mxu1 %v4190_v5  ;;  %3810 = vmatpush3.bf16.msra.mxu0 %v4191_v6 }
 0x187   : > { %3771 = vmatprep.subr.bf16.mxu1 %v4192_v3  ;;  %3811 = vmatprep.subr.bf16.mxu0 %v4193_v7  ;;  %v1561_v3 = vld [vmem:[#allocation7 + $0x50] sm:$0xff] }
 0x188   : > { %1266 = vmatmul.mubr.bf16.gmra.mxu1 %v4739_v26  ;;  %1339 = vmatmul.mubr.bf16.gmra.mxu0 %v4739_v26  ;;  %v717_v26 = vsub.s32 2, %v708_v24 }
 0x189   : > { %1275 = vmatprep.mubr.bf16.mxu1 %v4469_v29  ;;  %1348 = vmatprep.mubr.bf16.mxu0 %v4469_v29  ;;  %v4201_v29 = vld [vmem:[#allocation8 + $0xc8] sm:$0xff]  }
 0x18a   : > { %3772 = vmatpush3.bf16.msra.mxu1 %v4194_v8  ;;  %3812 = vmatpush3.bf16.msra.mxu0 %v4195_v9  ;;  %v4764_v30 = vrot.slane %v705_v27, %v717_v26  ;;  %v4786_v8 = vrot.slane %v705_v27, %v737_v51 }
 0x18b   : > { %3773 = vmatprep.subr.bf16.mxu1 %v4196_v10  ;;  %3813 = vmatprep.subr.bf16.mxu0 %v4197_v11 }
 0x18e   : > { %3774 = vmatpush3.bf16.msra.mxu1 %v4198_v12  ;;  %3814 = vmatpush3.bf16.msra.mxu0 %v4199_v13 }
 0x18f   : > { %3775 = vmatprep.subr.bf16.mxu1 %v4200_v14  ;;  %3815 = vmatprep.subr.bf16.mxu0 %v4201_v29 }
 0x190   : > { %1276 = vmatmul.mubr.bf16.gmra.mxu1 %v640_v50  ;;  %1349 = vmatmul.mubr.bf16.gmra.mxu0 %v640_v50 }
 0x192   : > { %3776 = vmatpush3.bf16.msra.mxu1 %v4202_v15  ;;  %3816 = vmatpush3.bf16.msra.mxu0 %v4203_v16 }
 0x193   : > { %3777 = vmatprep.subr.bf16.mxu1 %v4204_v17  ;;  %3817 = vmatprep.subr.bf16.mxu0 %v4205_v18 }
 0x196   : > { %3778 = vmatpush3.bf16.msra.mxu1 %v4206_v19  ;;  %3818 = vmatpush3.bf16.msra.mxu0 %v4207_v20 }
 0x197   : > { %3843 = vmatprep.subr.bf16.mxu1 %v4208_v21  ;;  %3883 = vmatprep.subr.bf16.mxu0 %v4209_v22 }
 0x218   : > { %v1101_v33 = vpop.f32.mrf.mxu1  ;;  %v1174_v34 = vpop.f32.mrf.mxu0 }
 0x219   : > { %v1102_v35 = vadd.f32 %v1101_v33, %v4762_v28  ;;  %v1175_v36 = vadd.f32 %v1174_v34, %v4764_v30 }
 0x21a   : > { %v1103_v38 = vpop.f32.mrf.mxu1  ;;  %v1176_v39 = vpop.f32.mrf.mxu0 }
 0x21b   : > { %vm1359_vm0 = vcmp.gt.f32.partialorder %v1102_v35, 0.0  ;;  %v1423_v42 = vmul.f32 0.01, %v1102_v35  ;;  %v1425_v43 = vmul.f32 0.01, %v1175_v36  ;;  %vm1361_vm1 = vcmp.gt.f32.partialorder %v1175_v36, 0.0 }
 0x21c   : > { %v1105_v46 = vpop.f32.mrf.mxu1  ;;  %v1178_v47 = vpop.f32.mrf.mxu0  ;;  %v1104_v54 = vadd.f32 %v1103_v38, %v4768_v37  ;;  %v1177_v61 = vadd.f32 %v1176_v39, %v4770_v45 }
 0x21d   : > { %v1106_v49 = vadd.f32 %v1105_v46, %v4762_v28  ;;  %v1179_v50 = vadd.f32 %v1178_v47, %v4764_v30  ;;  %v1487_v52 = vsel %vm1359_vm0, %v1102_v35, %v1423_v42  ;;  %v1489_v59 = vsel %vm1361_vm1, %v1175_v36, %v1425_v43 }
 0x21e   : > { %v1107_v55 = vpop.f32.mrf.mxu1  ;;  %v1180_v56 = vpop.f32.mrf.mxu0  ;;  %v4783_v5 = vmul.f32 %v1551_v53, %v1487_v52  ;;  %v4788_v9 = vmul.f32 %v1553_v60, %v1489_v59  ;;  %vm1360_vm4 = vcmp.gt.f32.partialorder %v1104_v54, 0.0  ;;  %v1424_v14 = vmul.f32 0.01, %v1104_v54  ;;  %v1554_v59 = vld [vmem:[#allocation7 + $0x18] sm:$0xff] }
 0x21f   : > { %vm1367_vm2 = vcmp.gt.f32.partialorder %v1106_v49, 0.0  ;;  %v1431_v62 = vmul.f32 0.01, %v1106_v49  ;;  %vm1369_vm3 = vcmp.gt.f32.partialorder %v1179_v50, 0.0  ;;  %v1433_v0 = vmul.f32 0.01, %v1179_v50 }
 0x220   : > { %v1108_v1 = vadd.f32 %v1107_v55, %v4768_v37  ;;  %v1111_v2 = vpop.f32.mrf.mxu1  ;;  %v1184_v4 = vpop.f32.mrf.mxu0  ;;  %v1181_v7 = vadd.f32 %v1180_v56, %v4770_v45  ;;  %vm1362_vm5 = vcmp.gt.f32.partialorder %v1177_v61, 0.0  ;;  %v1426_v29 = vmul.f32 0.01, %v1177_v61 }
 0x221   : > { %v1495_v6 = vsel %vm1367_vm2, %v1106_v49, %v1431_v62  ;;  %v1497_v10 = vsel %vm1369_vm3, %v1179_v50, %v1433_v0  ;;  %v1112_v11 = vadd.f32 %v1111_v2, %v4762_v28  ;;  %v1185_v18 = vadd.f32 %v1184_v4, %v4764_v30  ;;  %v1552_v49 = vld [vmem:[#allocation7 + $0x8] sm:$0xff] }
 0x222   : > { %v1113_v12 = vpop.f32.mrf.mxu1  ;;  %v1186_v13 = vpop.f32.mrf.mxu0  ;;  %v4791_v15 = vmul.f32 %v1559_v63, %v1495_v6  ;;  %v4793_v16 = vmul.f32 %v1561_v3, %v1497_v10  ;;  %vm1368_vm6 = vcmp.gt.f32.partialorder %v1108_v1, 0.0  ;;  %v1432_v17 = vmul.f32 0.01, %v1108_v1  ;;  %v1560_v50 = vld [vmem:[#allocation7 + $0x48] sm:$0xff]  ;;  %v1562_v63 = vld [vmem:[#allocation7 + $0x58] sm:$0xff] }
 0x223   : > { %vm1370_vm7 = vcmp.gt.f32.partialorder %v1181_v7, 0.0  ;;  %v1434_v21 = vmul.f32 0.01, %v1181_v7  ;;  %v1114_v22 = vadd.f32 %v1113_v12, %v4768_v37  ;;  %v1187_v23 = vadd.f32 %v1186_v13, %v4770_v45 }
 0x224   : > { %v1115_v19 = vpop.f32.mrf.mxu1  ;;  %v1188_v20 = vpop.f32.mrf.mxu0  ;;  %vm1375_vm8 = vcmp.gt.f32.partialorder %v1112_v11, 0.0  ;;  %v1439_v24 = vmul.f32 0.01, %v1112_v11  ;;  %vm1377_vm9 = vcmp.gt.f32.partialorder %v1185_v18, 0.0  ;;  %v1488_v31 = vsel %vm1360_vm4, %v1104_v54, %v1424_v14 }
 0x225   : > { %v1116_v25 = vadd.f32 %v1115_v19, %v4762_v28  ;;  %v1441_v32 = vmul.f32 0.01, %v1185_v18  ;;  %v1440_v33 = vmul.f32 0.01, %v1114_v22  ;;  %v1442_v34 = vmul.f32 0.01, %v1187_v23 }
 0x226   : > { %v1117_v26 = vpop.f32.mrf.mxu1  ;;  %v1190_v27 = vpop.f32.mrf.mxu0  ;;  %vm1376_vm10 = vcmp.gt.f32.partialorder %v1114_v22, 0.0  ;;  %vm1378_vm11 = vcmp.gt.f32.partialorder %v1187_v23, 0.0  ;;  %v1189_v36 = vadd.f32 %v1188_v20, %v4764_v30  ;;  %v1490_v40 = vsel %vm1362_vm5, %v1177_v61, %v1426_v29 }
 0x227   : > { %v1447_v35 = vmul.f32 0.01, %v1116_v25  ;;  %v1679_v41 = vpack.c.bf16 %v4791_v15, %v4783_v5  ;;  %vm1383_vm12 = vcmp.gt.f32.partialorder %v1116_v25, 0.0  ;;  %v1118_v42 = vadd.f32 %v1117_v26, %v4768_v37  ;;  %v4210_v15 = vld [vmem:[#allocation8 + $0x138] sm:$0xff]  }
 0x228   : > { %v1121_v38 = vpop.f32.mrf.mxu1  ;;  %v1194_v39 = vpop.f32.mrf.mxu0  ;;  %v1681_v43 = vpack.c.bf16 %v4793_v16, %v4788_v9  ;;  %v1496_v46 = vsel %vm1368_vm6, %v1108_v1, %v1432_v17  ;;  %v1498_v47 = vsel %vm1370_vm7, %v1181_v7, %v1434_v21  ;;  %v4810_v48 = vadd.f32 %v1190_v27, %v4770_v45  ;;  %v4212_v21 = vld [vmem:[#allocation8 + $0x170] sm:$0xff]  }
 0x229   : > { %v4813_v53 = vsel %vm1375_vm8, %v1112_v11, %v1439_v24  ;;  %v4816_v54 = vsel %vm1377_vm9, %v1185_v18, %v1441_v32  ;;  %v4819_v55 = vsel %vm1376_vm10, %v1114_v22, %v1440_v33  ;;  %v4822_v56 = vsel %vm1378_vm11, %v1187_v23, %v1442_v34  ;;  %v4211_v18 = vld [vmem:[#allocation8 + $0x1b8] sm:$0xff]   ;;  %v4213_v22 = vld [vmem:[#allocation8 + $0x1f0] sm:$0xff]   ;;  %v1568_v33 = vld [vmem:[#allocation7 + $0x88] sm:$0xff] }
 0x22a   : > { %v1123_v51 = vpop.f32.mrf.mxu1  ;;  %v1196_v52 = vpop.f32.mrf.mxu0  ;;  %v4824_v60 = vsel %vm1383_vm12, %v1116_v25, %v1447_v35  ;;  %vm1385_vm13 = vcmp.gt.f32.partialorder %v1189_v36, 0.0  ;;  %v1449_v61 = vmul.f32 0.01, %v1189_v36  ;;  %v1122_v62 = vadd.f32 %v1121_v38, %v4762_v28  ;;  %v4214_v32 = vld [vmem:[#allocation8 + $0x130] sm:$0xff]   ;;  %v1576_v34 = vld [vmem:[#allocation7 + $0xc8] sm:$0xff] }
 0x22b   : > { %vm1384_vm14 = vcmp.gt.f32.partialorder %v1118_v42, 0.0  ;;  %v1195_v2 = vadd.f32 %v1194_v39, %v4764_v30  ;;  %v1616_v4 = vmul.f32 %v1552_v49, %v1488_v31  ;;  %v1624_v5 = vmul.f32 %v1560_v50, %v1496_v46  ;;  %v4215_v16 = vld [vmem:[#allocation8 + $0x1b0] sm:$0xff]  }
 0x22c   : > { %v1125_v0 = vpop.f32.mrf.mxu1  ;;  %v1198_v1 = vpop.f32.mrf.mxu0  ;;  %v1448_v6 = vmul.f32 0.01, %v1118_v42  ;;  %vm1386_vm15 = vcmp.gt.f32.partialorder %v4810_v48, 0.0  ;;  %v1450_v3 = vmul.f32 0.01, %v4810_v48  ;;  %v1618_v7 = vmul.f32 %v1554_v59, %v1490_v40 }
 0x22d   : > { %v1680_v12 = vpack.c.bf16 %v1624_v5, %v1616_v4  ;;  %v1626_v13 = vmul.f32 %v1562_v63, %v1498_v47  ;;  %v1124_v14 = vadd.f32 %v1123_v51, %v4768_v37  ;;  %v1197_v29 = vadd.f32 %v1196_v52, %v4770_v45  ;;  %v4217_v4 = vld [vmem:[#allocation8 + $0x1e8] sm:$0xff]  }
 0x22e   : > { %v1127_v10 = vpop.f32.mrf.mxu1  ;;  %v1200_v11 = vpop.f32.mrf.mxu0  ;;  %v4833_v17 = vsel %vm1385_vm13, %v1189_v36, %v1449_v61  ;;  %v1126_v19 = vadd.f32 %v1125_v0, %v4762_v28  ;;  %v1199_v20 = vadd.f32 %v1198_v1, %v4764_v30  ;;  %vm1391_vm0 = vcmp.gt.f32.partialorder %v1122_v62, 0.0  ;;  %v1578_v61 = vld [vmem:[#allocation7 + $0xd8] sm:$0xff]  ;;  %v1567_v1 = vld [vmem:[#allocation7 + $0x80] sm:$0xff] }
 0x22f   : > { %v1128_v23 = vadd.f32 %v1127_v10, %v4768_v37  ;;  %v1455_v26 = vmul.f32 0.01, %v1122_v62  ;;  %v1457_v27 = vmul.f32 0.01, %v1195_v2  ;;  %2255 = vmatprep.mubr.bf16.mxu1 %v1680_v12  ;;  %v1682_v31 = vpack.c.bf16 %v1626_v13, %v1618_v7  ;;  %v1577_v12 = vld [vmem:[#allocation7 + $0xd0] sm:$0xff]  ;;  %v4218_v13 = vld [vmem:[#allocation8 + $0x128] sm:$0xff]  }
 0x230   : > { %v1131_v24 = vpop.f32.mrf.mxu1  ;;  %v1204_v25 = vpop.f32.mrf.mxu0  ;;  %vm1393_vm1 = vcmp.gt.f32.partialorder %v1195_v2, 0.0  ;;  %2256 = vmatmul.mubr.bf16.vlgmr.msra.gmra.mxu1 %v1679_v41  ;;  %vm1392_vm2 = vcmp.gt.f32.partialorder %v1124_v14, 0.0  ;;  %v1456_v35 = vmul.f32 0.01, %v1124_v14  ;;  %v1458_v36 = vmul.f32 0.01, %v1197_v29 }
 0x231   : > { %v1512_v40 = vsel %vm1384_vm14, %v1118_v42, %v1448_v6  ;;  %2320 = vmatprep.mubr.bf16.mxu0 %v1682_v31  ;;  %3844 = vmatpush3.bf16.msra.mxu1 %v4210_v15  ;;  %v1463_v46 = vmul.f32 0.01, %v1126_v19  ;;  %v1465_v47 = vmul.f32 0.01, %v1199_v20  ;;  %v1464_v49 = vmul.f32 0.01, %v1128_v23 }
 0x232   : > { %v4838_v38 = vpop.f32.mrf.mxu1  ;;  %v4840_v39 = vpop.f32.mrf.mxu0  ;;  %2321 = vmatmul.mubr.bf16.vlgmr.msra.gmra.mxu0 %v1681_v43  ;;  %vm1394_vm3 = vcmp.gt.f32.partialorder %v1197_v29, 0.0  ;;  %vm1399_vm4 = vcmp.gt.f32.partialorder %v1126_v19, 0.0  ;;  %vm1401_vm5 = vcmp.gt.f32.partialorder %v1199_v20, 0.0  ;;  %3845 = vmatprep.subr.bf16.mxu1 %v4212_v21  ;;  %vm1400_vm6 = vcmp.gt.f32.partialorder %v1128_v23, 0.0  ;;  %v4216_v41 = vld [vmem:[#allocation8 + $0x168] sm:$0xff]   ;;  %v1570_v43 = vld [vmem:[#allocation7 + $0x98] sm:$0xff] }
 0x233   : > { %v1514_v42 = vsel %vm1386_vm15, %v4810_v48, %v1450_v3  ;;  %v4850_v52 = vsel %vm1391_vm0, %v1122_v62, %v1455_v26  ;;  %v4853_v59 = vsel %vm1393_vm1, %v1195_v2, %v1457_v27  ;;  %3884 = vmatpush3.bf16.msra.mxu0 %v4211_v18  ;;  %v4856_v9 = vadd.f32 %v1200_v11, %v4770_v45  ;;  %v1575_v2 = vld [vmem:[#allocation7 + $0xc0] sm:$0xff] }
 0x234   : > { %v1135_v50 = vpop.f32.mrf.mxu1  ;;  %v1208_v51 = vpop.f32.mrf.mxu0  ;;  %v4859_v63 = vsel %vm1392_vm2, %v1124_v14, %v1456_v35  ;;  %3885 = vmatprep.subr.bf16.mxu0 %v4213_v22  ;;  %v4862_v0 = vadd.f32 %v1131_v24, %v4762_v28  ;;  %v1632_v48 = vmul.f32 %v1568_v33, %v4819_v55  ;;  %v1640_v62 = vmul.f32 %v1576_v34, %v1512_v40  ;;  %v1569_v55 = vld [vmem:[#allocation7 + $0x90] sm:$0xff]  ;;  %v4222_v40 = vld [vmem:[#allocation8 + $0x120] sm:$0xff]  }
 0x235   : > { %v4868_v3 = vsel %vm1394_vm3, %v1197_v29, %v1458_v36  ;;  %v4871_v7 = vsel %vm1399_vm4, %v1126_v19, %v1463_v46  ;;  %v4874_v10 = vsel %vm1401_vm5, %v1199_v20, %v1465_v47  ;;  %v4877_v11 = vsel %vm1400_vm6, %v1128_v23, %v1464_v49  ;;  %3846 = vmatpush3.bf16.msra.mxu1 %v4214_v32  ;;  %v4220_v19 = vld [vmem:[#allocation8 + $0x160] sm:$0xff]   ;;  %v1584_v49 = vld [vmem:[#allocation7 + $0x108] sm:$0xff] }
 0x236   : > { %v1137_v5 = vpop.f32.mrf.mxu1  ;;  %v4865_v6 = vpop.f32.mrf.mxu0  ;;  %v4880_v14 = vadd.f32 %v1204_v25, %v4764_v30  ;;  %v1688_v15 = vpack.c.bf16 %v1640_v62, %v1632_v48  ;;  %v1634_v29 = vmul.f32 %v1570_v43, %v4822_v56  ;;  %v1642_v18 = vmul.f32 %v1578_v61, %v1514_v42  ;;  %3847 = vmatprep.subr.bf16.mxu1 %v4216_v41  ;;  %v4219_v25 = vld [vmem:[#allocation8 + $0x1a8] sm:$0xff]   ;;  %v4221_v32 = vld [vmem:[#allocation8 + $0x1e0] sm:$0xff]  }
 0x237   : > { %vm1402_vm7 = vcmp.gt.f32.partialorder %v4856_v9, 0.0  ;;  %v1466_v20 = vmul.f32 0.01, %v4856_v9  ;;  %3886 = vmatpush3.bf16.msra.mxu0 %v4215_v16  ;;  %v1631_v23 = vmul.f32 %v1567_v1, %v4813_v53  ;;  %v1639_v24 = vmul.f32 %v1575_v2, %v4824_v60  ;;  %v4223_v47 = vld [vmem:[#allocation8 + $0x1a0] sm:$0xff]   ;;  %v1592_v41 = vld [vmem:[#allocation7 + $0x148] sm:$0xff] }
 0x238   : > { %v1247_v21 = vpop.f32.mrf.mxu1  ;;  %v4883_v22 = vpop.f32.mrf.mxu0  ;;  %v1471_v26 = vmul.f32 0.01, %v4862_v0  ;;  %2263 = vmatprep.mubr.bf16.mxu1 %v1688_v15  ;;  %v1690_v56 = vpack.c.bf16 %v1642_v18, %v1634_v29  ;;  %v1633_v27 = vmul.f32 %v1569_v55, %v4816_v54  ;;  %v1641_v31 = vmul.f32 %v1577_v12, %v4833_v17  ;;  %3887 = vmatprep.subr.bf16.mxu0 %v4217_v4  ;;  %v1586_v15 = vld [vmem:[#allocation7 + $0x118] sm:$0xff] }
 0x239   : > { %v1687_v35 = vpack.c.bf16 %v1639_v24, %v1631_v23  ;;  %v1134_v53 = vadd.f32 %v4838_v38, %v4768_v37  ;;  %v1207_v60 = vadd.f32 %v4840_v39, %v4770_v45  ;;  %3848 = vmatpush3.bf16.msra.mxu1 %v4218_v13  ;;  %v1136_v36 = vadd.f32 %v1135_v50, %v4762_v28  ;;  %v4224_v38 = vld [vmem:[#allocation8 + $0x158] sm:$0xff]  }
 0x23a   : > { %v4892_v33 = vpop.f32.mrf.mxu1  ;;  %v4894_v34 = vpop.f32.mrf.mxu0  ;;  %vm1407_vm8 = vcmp.gt.f32.partialorder %v4862_v0, 0.0  ;;  %2328 = vmatprep.mubr.bf16.mxu0 %v1690_v56  ;;  %v1689_v54 = vpack.c.bf16 %v1641_v31, %v1633_v27  ;;  %v1209_v17 = vadd.f32 %v1208_v51, %v4764_v30  ;;  %3849 = vmatprep.subr.bf16.mxu1 %v4220_v19  ;;  %v1138_v46 = vadd.f32 %v1137_v5, %v4768_v37  ;;  %v4225_v30 = vld [vmem:[#allocation8 + $0x1d8] sm:$0xff]   ;;  %v4228_v5 = vld [vmem:[#allocation8 + $0x150] sm:$0xff]  }
 0x23b   : > { %v1530_v28 = vsel %vm1402_vm7, %v4856_v9, %v1466_v20  ;;  %vm1409_vm9 = vcmp.gt.f32.partialorder %v4880_v14, 0.0  ;;  %v1473_v50 = vmul.f32 0.01, %v4880_v14  ;;  %2264 = vmatmul.mubr.bf16.gmra.mxu1 %v1687_v35  ;;  %vm1408_vm10 = vcmp.gt.f32.partialorder %v1134_v53, 0.0  ;;  %3888 = vmatpush3.bf16.msra.mxu0 %v4219_v25  ;;  %v4226_v37 = vld [vmem:[#allocation8 + $0x118] sm:$0xff]   ;;  %v1591_v20 = vld [vmem:[#allocation7 + $0x140] sm:$0xff] }
 0x23c   : > { %v4904_v42 = vpop.f32.mrf.mxu1  ;;  %v4906_v39 = vpop.f32.mrf.mxu0  ;;  %2329 = vmatmul.mubr.bf16.gmra.mxu0 %v1689_v54  ;;  %v1472_v51 = vmul.f32 0.01, %v1134_v53  ;;  %vm1410_vm11 = vcmp.gt.f32.partialorder %v1207_v60, 0.0  ;;  %v1474_v16 = vmul.f32 0.01, %v1207_v60  ;;  %vm1415_vm12 = vcmp.gt.f32.partialorder %v1136_v36, 0.0  ;;  %3889 = vmatprep.subr.bf16.mxu0 %v4221_v32 }
 0x23d   : > { %v4920_v9 = vsel %vm1407_vm8, %v4862_v0, %v1471_v26  ;;  %v1479_v48 = vmul.f32 0.01, %v1136_v36  ;;  %v1481_v62 = vmul.f32 0.01, %v1209_v17  ;;  %v1480_v1 = vmul.f32 0.01, %v1138_v46  ;;  %3850 = vmatpush3.bf16.msra.mxu1 %v4222_v40 }
 0x23e   : > { %v4913_v43 = vpop.f32.mrf.mxu1  ;;  %v4915_v61 = vpop.f32.mrf.mxu0  ;;  %vm1417_vm13 = vcmp.gt.f32.partialorder %v1209_v17, 0.0  ;;  %vm1416_vm14 = vcmp.gt.f32.partialorder %v1138_v46, 0.0  ;;  %v4924_v2 = vadd.f32 %v4865_v6, %v4770_v45  ;;  %v1248_v4 = vadd.f32 %v1247_v21, %v4775_v57  ;;  %3851 = vmatprep.subr.bf16.mxu1 %v4224_v38  ;;  %v1594_v29 = vld [vmem:[#allocation7 + $0x158] sm:$0xff]  ;;  %v1585_v56 = vld [vmem:[#allocation7 + $0x110] sm:$0xff] }
 0x23f   : > { %v4934_v0 = vsel %vm1409_vm9, %v4880_v14, %v1473_v50  ;;  %3890 = vmatpush3.bf16.msra.mxu0 %v4223_v47  ;;  %v1321_v13 = vadd.f32 %v4883_v22, %v4777_v58  ;;  %v1648_v45 = vmul.f32 %v1584_v49, %v4859_v63  ;;  %v1656_v6 = vmul.f32 %v1592_v41, %v4877_v11  ;;  %v1583_v14 = vld [vmem:[#allocation7 + $0x100] sm:$0xff]  ;;  %v4227_v23 = vld [vmem:[#allocation8 + $0x198] sm:$0xff]   ;;  %v1593_v27 = vld [vmem:[#allocation7 + $0x150] sm:$0xff] }
 0x240   : > { %v4927_v55 = vpop.f32.mrf.mxu1  ;;  %v4929_v12 = vpop.f32.mrf.mxu0  ;;  %v4941_v18 = vsel %vm1408_vm10, %v1134_v53, %v1472_v51  ;;  %v4944_v19 = vsel %vm1410_vm11, %v1207_v60, %v1474_v16  ;;  %vm1363_vm15 = vcmp.gt.f32.partialorder %v1248_v4, 0.0  ;;  %v1427_v21 = vmul.f32 0.01, %v1248_v4  ;;  %3891 = vmatprep.subr.bf16.mxu0 %v4225_v30  ;;  %v4229_v31 = vld [vmem:[#allocation8 + $0x1d0] sm:$0xff]   ;;  %v1563_v30 = vld [vmem:[#allocation7 + $0x60] sm:$0xff] }
 0x241   : > { %v4951_v63 = vsel %vm1415_vm12, %v1136_v36, %v1479_v48  ;;  %v4954_v11 = vsel %vm1417_vm13, %v1209_v17, %v1481_v62  ;;  %v4957_v25 = vsel %vm1416_vm14, %v1138_v46, %v1480_v1  ;;  %v1696_v26 = vpack.c.bf16 %v1656_v6, %v1648_v45  ;;  %3852 = vmatpush3.bf16.msra.mxu1 %v4226_v37  ;;  %v4230_v60 = vld [vmem:[#allocation8 + $0x110] sm:$0xff]   ;;  %v4232_v46 = vld [vmem:[#allocation8 + $0x148] sm:$0xff]   ;;  %v1555_v51 = vld [vmem:[#allocation7 + $0x20] sm:$0xff] }
 0x242   : > { %v4946_v24 = vpop.f32.mrf.mxu1  ;;  %v4948_v22 = vpop.f32.mrf.mxu0  ;;  %vm1418_vm0 = vcmp.gt.f32.partialorder %v4924_v2, 0.0  ;;  %v1429_v32 = vmul.f32 0.01, %v1321_v13  ;;  %v1650_v35 = vmul.f32 %v1586_v15, %v4868_v3  ;;  %v1658_v53 = vmul.f32 %v1594_v29, %v1530_v28  ;;  %3853 = vmatprep.subr.bf16.mxu1 %v4228_v5  ;;  %v1557_v16 = vld [vmem:[#allocation7 + $0x30] sm:$0xff]  ;;  %v4233_v62 = vld [vmem:[#allocation8 + $0x1c8] sm:$0xff]   ;;  %v4236_v1 = vld [vmem:[#allocation8 + $0x140] sm:$0xff]  }
 0x243   : > { %v1491_v40 = vsel %vm1363_vm15, %v1248_v4, %v1427_v21  ;;  %vm1365_vm1 = vcmp.gt.f32.partialorder %v1321_v13, 0.0  ;;  %2271 = vmatprep.mubr.bf16.mxu1 %v1696_v26  ;;  %v1647_v54 = vmul.f32 %v1583_v14, %v4850_v52  ;;  %v1655_v17 = vmul.f32 %v1591_v20, %v4871_v7  ;;  %3892 = vmatpush3.bf16.msra.mxu0 %v4227_v23  ;;  %v1565_v15 = vld [vmem:[#allocation7 + $0x70] sm:$0xff]  ;;  %v4235_v14 = vld [vmem:[#allocation8 + $0x188] sm:$0xff]  }
 0x244   : > { %v4961_v36 = vpop.f32.mrf.mxu1  ;;  %v4966_v47 = vpop.f32.mrf.mxu0  ;;  %v1698_v49 = vpack.c.bf16 %v1658_v53, %v1650_v35  ;;  %v1649_v41 = vmul.f32 %v1585_v56, %v4853_v59  ;;  %v1657_v3 = vmul.f32 %v1593_v27, %v4874_v10  ;;  %v1250_v38 = vadd.f32 %v4892_v33, %v4781_v44  ;;  %3893 = vmatprep.subr.bf16.mxu0 %v4229_v31  ;;  %v4231_v59 = vld [vmem:[#allocation8 + $0x190] sm:$0xff]   ;;  %v1600_v27 = vld [vmem:[#allocation7 + $0x188] sm:$0xff]  ;;  %v1602_v31 = vld [vmem:[#allocation7 + $0x198] sm:$0xff] }
 0x245   : > { %v1695_v50 = vpack.c.bf16 %v1655_v17, %v1647_v54  ;;  %v1323_v52 = vadd.f32 %v4894_v34, %v4786_v8  ;;  %v1252_v7 = vadd.f32 %v4904_v42, %v4775_v57  ;;  %v1325_v37 = vadd.f32 %v4906_v39, %v4777_v58  ;;  %3854 = vmatpush3.bf16.msra.mxu1 %v4230_v60  ;;  %v4234_v42 = vld [vmem:[#allocation8 + $0x108] sm:$0xff]   ;;  %v4237_v35 = vld [vmem:[#allocation8 + $0x1c0] sm:$0xff]   ;;  %v1610_v17 = vld [vmem:[#allocation7 + $0x1d8] sm:$0xff] }
 0x246   : > { %v4972_v28 = vpop.f32.mrf.mxu1  ;;  %v1482_v10 = vmul.f32 0.01, %v4924_v2  ;;  %v1493_v33 = vsel %vm1365_vm1, %v1321_v13, %v1429_v32  ;;  %2336 = vmatprep.mubr.bf16.mxu0 %v1698_v49  ;;  %v1697_v48 = vpack.c.bf16 %v1657_v3, %v1649_v41  ;;  %v1254_v34 = vadd.f32 %v4913_v43, %v4781_v44  ;;  %3855 = vmatprep.subr.bf16.mxu1 %v4232_v46  ;;  %v4984_v5 = vpop.f32.mrf.mxu0  ;;  %v1599_v32 = vld [vmem:[#allocation7 + $0x180] sm:$0xff]  ;;  %v1608_v54 = vld [vmem:[#allocation7 + $0x1c8] sm:$0xff] }
 0x247   : > { %2272 = vmatmul.mubr.bf16.gmra.mxu1 %v1695_v50  ;;  %vm1364_vm2 = vcmp.gt.f32.partialorder %v1250_v38, 0.0  ;;  %v1428_v39 = vmul.f32 0.01, %v1250_v38  ;;  %vm1371_vm3 = vcmp.gt.f32.partialorder %v1252_v7, 0.0  ;;  %v1435_v4 = vmul.f32 0.01, %v1252_v7  ;;  %3894 = vmatpush3.bf16.msra.mxu0 %v4231_v59 }
 0x248   : > { %v4986_v45 = vpop.f32.mrf.mxu1  ;;  %2337 = vmatmul.mubr.bf16.gmra.mxu0 %v1697_v48  ;;  %vm1366_vm4 = vcmp.gt.f32.partialorder %v1323_v52, 0.0  ;;  %v1430_v13 = vmul.f32 0.01, %v1323_v52  ;;  %vm1373_vm5 = vcmp.gt.f32.partialorder %v1325_v37, 0.0  ;;  %v1437_v6 = vmul.f32 0.01, %v1325_v37  ;;  %3895 = vmatprep.subr.bf16.mxu0 %v4233_v62  ;;  %v5012_v46 = vpop.f32.mrf.mxu0 }
 0x249   : > { %v1499_v43 = vsel %vm1371_vm3, %v1252_v7, %v1435_v4  ;;  %vm1372_vm6 = vcmp.gt.f32.partialorder %v1254_v34, 0.0  ;;  %v1436_v29 = vmul.f32 0.01, %v1254_v34  ;;  %v4990_v21 = vadd.f32 %v4915_v61, %v4786_v8  ;;  %3856 = vmatpush3.bf16.msra.mxu1 %v4234_v42  ;;  %v1609_v50 = vld [vmem:[#allocation7 + $0x1d0] sm:$0xff] }
 0x24a   : > { %v1546_v20 = vsel %vm1418_vm0, %v4924_v2, %v1482_v10  ;;  %v4995_v23 = vmul.f32 %v1563_v30, %v1499_v43  ;;  %v1501_v26 = vsel %vm1373_vm5, %v1325_v37, %v1437_v6  ;;  %v4999_v56 = vadd.f32 %v4927_v55, %v4775_v57  ;;  %v4238_v55 = vld [vmem:[#allocation8 + $0x100] sm:$0xff]   ;;  %v5014_v49 = vpop.f32.mrf.mxu1  ;;  %3857 = vmatprep.subr.bf16.mxu1 %v4236_v1  ;;  %v1342_v62 = vpop.f32.mrf.mxu0 }
 0x24b   : > { %v5001_v61 = vmul.f32 %v1555_v51, %v1491_v40  ;;  %v5003_v53 = vmul.f32 %v1557_v16, %v1493_v33  ;;  %v5006_v60 = vsel %vm1364_vm2, %v1250_v38, %v1428_v39  ;;  %v5010_v2 = vadd.f32 %v4929_v12, %v4777_v58  ;;  %v1607_v12 = vld [vmem:[#allocation7 + $0x1c0] sm:$0xff]  ;;  %v1601_v38 = vld [vmem:[#allocation7 + $0x190] sm:$0xff]  ;;  %3896 = vmatpush3.bf16.msra.mxu0 %v4235_v14  ;;  %v1556_v14 = vld [vmem:[#allocation7 + $0x28] sm:$0xff] }
 0x24c   : > { %v5017_v40 = vsel %vm1366_vm4, %v1323_v52, %v1430_v13  ;;  %v5019_v41 = vmul.f32 %v1565_v15, %v1501_v26  ;;  %v5022_v3 = vsel %vm1372_vm6, %v1254_v34, %v1436_v29  ;;  %vm1374_vm7 = vcmp.gt.f32.partialorder %v4990_v21, 0.0  ;;  %v4239_v37 = vld [vmem:[#allocation8 + $0x180] sm:$0xff]   ;;  %3897 = vmatprep.subr.bf16.mxu0 %v4237_v35  ;;  %v1271_v42 = vpop.f32.mrf.mxu1  ;;  %v1344_v43 = vpop.f32.mrf.mxu0  ;;  %v1558_v35 = vld [vmem:[#allocation7 + $0x38] sm:$0xff] }
 0x24d   : > { %v1683_v7 = vpack.c.bf16 %v4995_v23, %v5001_v61  ;;  %v1438_v30 = vmul.f32 0.01, %v4990_v21  ;;  %vm1379_vm8 = vcmp.gt.f32.partialorder %v4999_v56, 0.0  ;;  %v1443_v52 = vmul.f32 0.01, %v4999_v56  ;;  %3858 = vmatpush3.bf16.msra.mxu1 %v4238_v55 }
 0x24e   : > { %v1664_v59 = vmul.f32 %v1600_v27, %v4941_v18  ;;  %v1672_v10 = vmul.f32 %v1608_v54, %v4957_v25  ;;  %v1666_v51 = vmul.f32 %v1602_v31, %v4944_v19  ;;  %v1674_v33 = vmul.f32 %v1610_v17, %v1546_v20  ;;  %v1273_v15 = vpop.f32.mrf.mxu1  ;;  %v1564_v20 = vld [vmem:[#allocation7 + $0x68] sm:$0xff]  ;;  %v1346_v55 = vpop.f32.mrf.mxu0 }
 0x24f   : > { %vm1381_vm9 = vcmp.gt.f32.partialorder %v5010_v2, 0.0  ;;  %v1663_v16 = vmul.f32 %v1599_v32, %v4920_v9  ;;  %v1671_v48 = vmul.f32 %v1607_v12, %v4951_v63  ;;  %v1665_v34 = vmul.f32 %v1601_v38, %v4934_v0  ;;  %3898 = vmatpush3.bf16.msra.mxu0 %v4239_v37 }
 0x250   : > { %v1704_v1 = vpack.c.bf16 %v1672_v10, %v1664_v59  ;;  %v1706_v39 = vpack.c.bf16 %v1674_v33, %v1666_v51  ;;  %v1673_v18 = vmul.f32 %v1609_v50, %v4954_v11  ;;  %v1260_v19 = vadd.f32 %v4946_v24, %v4781_v44  ;;  %v1350_v33 = vpop.f32.mrf.mxu0 }
 0x251   : > { %v1703_v25 = vpack.c.bf16 %v1671_v48, %v1663_v16  ;;  %v1333_v4 = vadd.f32 %v4948_v22, %v4786_v8  ;;  %v1262_v9 = vadd.f32 %v4961_v36, %v4775_v57  ;;  %v1335_v0 = vadd.f32 %v4966_v47, %v4777_v58  ;;  %v1572_v16 = vld [vmem:[#allocation7 + $0xa8] sm:$0xff] }
 0x252   : > { %v1445_v63 = vmul.f32 0.01, %v5010_v2  ;;  %2279 = vmatprep.mubr.bf16.mxu1 %v1704_v1  ;;  %2344 = vmatprep.mubr.bf16.mxu0 %v1706_v39  ;;  %v1705_v13 = vpack.c.bf16 %v1673_v18, %v1665_v34  ;;  %v1444_v11 = vmul.f32 0.01, %v1260_v19  ;;  %v1264_v24 = vadd.f32 %v4972_v28, %v4781_v44  ;;  %v1580_v48 = vld [vmem:[#allocation7 + $0xe8] sm:$0xff] }
 0x253   : > { %v1685_v6 = vpack.c.bf16 %v5019_v41, %v5003_v53  ;;  %2280 = vmatmul.mubr.bf16.gmra.mxu1 %v1703_v25  ;;  %vm1380_vm10 = vcmp.gt.f32.partialorder %v1260_v19, 0.0  ;;  %v1446_v22 = vmul.f32 0.01, %v1333_v4  ;;  %v1451_v36 = vmul.f32 0.01, %v1262_v9  ;;  %v1566_v53 = vld [vmem:[#allocation7 + $0x78] sm:$0xff]  ;;  %v1277_v41 = vpop.f32.mrf.mxu1 }
 0x254   : > { %v1502_v47 = vsel %vm1374_vm7, %v4990_v21, %v1438_v30  ;;  %2345 = vmatmul.mubr.bf16.gmra.mxu0 %v1705_v13  ;;  %vm1382_vm11 = vcmp.gt.f32.partialorder %v1333_v4, 0.0  ;;  %vm1387_vm12 = vcmp.gt.f32.partialorder %v1262_v9, 0.0  ;;  %v1453_v29 = vmul.f32 0.01, %v1335_v0  ;;  %v1574_v13 = vld [vmem:[#allocation7 + $0xb8] sm:$0xff] }
 0x255   : > { %vm1389_vm13 = vcmp.gt.f32.partialorder %v1335_v0, 0.0  ;;  %vm1388_vm14 = vcmp.gt.f32.partialorder %v1264_v24, 0.0  ;;  %v1452_v28 = vmul.f32 0.01, %v1264_v24  ;;  %v1337_v26 = vadd.f32 %v4984_v5, %v4786_v8 }
 0x256   : > { %v5059_v27 = vsel %vm1379_vm8, %v4999_v56, %v1443_v52  ;;  %v5064_v21 = vsel %vm1381_vm9, %v5010_v2, %v1445_v63  ;;  %v1508_v31 = vsel %vm1380_vm10, %v1260_v19, %v1444_v11  ;;  %v1268_v32 = vadd.f32 %v4986_v45, %v4775_v57  ;;  %v1582_v11 = vld [vmem:[#allocation7 + $0xf8] sm:$0xff] }
 0x257   : > { %v5069_v54 = vsel %vm1382_vm11, %v1333_v4, %v1446_v22  ;;  %v5071_v5 = vsel %vm1387_vm12, %v1262_v9, %v1451_v36  ;;  %v1620_v17 = vmul.f32 %v1556_v14, %v5006_v60  ;;  %v1628_v56 = vmul.f32 %v1564_v20, %v5022_v3 }
 0x258   : > { %v5076_v2 = vsel %vm1389_vm13, %v1335_v0, %v1453_v29  ;;  %v1516_v12 = vsel %vm1388_vm14, %v1264_v24, %v1452_v28  ;;  %vm1390_vm15 = vcmp.gt.f32.partialorder %v1337_v26, 0.0  ;;  %v1341_v45 = vadd.f32 %v5012_v46, %v4777_v58  ;;  %v1571_v24 = vld [vmem:[#allocation7 + $0xa0] sm:$0xff]  ;;  %v1581_v29 = vld [vmem:[#allocation7 + $0xf0] sm:$0xff] }
 0x259   : > { %v1454_v38 = vmul.f32 0.01, %v1337_v26  ;;  %v1684_v50 = vpack.c.bf16 %v1628_v56, %v1620_v17  ;;  %v1622_v30 = vmul.f32 %v1558_v35, %v5017_v40  ;;  %v1630_v52 = vmul.f32 %v1566_v53, %v1502_v47  ;;  %v1279_v40 = vpop.f32.mrf.mxu1  ;;  %v1573_v47 = vld [vmem:[#allocation7 + $0xb0] sm:$0xff] }
 0x25a   : > { %vm1395_vm0 = vcmp.gt.f32.partialorder %v1268_v32, 0.0  ;;  %v1459_v60 = vmul.f32 0.01, %v1268_v32  ;;  %v1270_v3 = vadd.f32 %v5014_v49, %v4781_v44  ;;  %v1343_v37 = vadd.f32 %v1342_v62, %v4786_v8 }
 0x25b   : > { %2385 = vmatprep.mubr.bf16.mxu1 %v1684_v50  ;;  %v1686_v59 = vpack.c.bf16 %v1630_v52, %v1622_v30  ;;  %v1272_v10 = vadd.f32 %v1271_v42, %v4775_v57  ;;  %v1345_v51 = vadd.f32 %v1344_v43, %v4777_v58  ;;  %v1274_v46 = vadd.f32 %v1273_v15, %v4781_v44  ;;  %v1281_v25 = vpop.f32.mrf.mxu1  ;;  %v1579_v15 = vld [vmem:[#allocation7 + $0xe0] sm:$0xff] }
 0x25c   : > { %vm1397_vm1 = vcmp.gt.f32.partialorder %v1341_v45, 0.0  ;;  %v1461_v34 = vmul.f32 0.01, %v1341_v45  ;;  %2386 = vmatmul.mubr.bf16.vlgmr.msra.gmra.mxu1 %v1683_v7  ;;  %vm1396_vm2 = vcmp.gt.f32.partialorder %v1270_v3, 0.0  ;;  %v1460_v49 = vmul.f32 0.01, %v1270_v3  ;;  %v1352_v7 = vpop.f32.mrf.mxu0 }
 0x25d   : > { %v1518_v62 = vsel %vm1390_vm15, %v1337_v26, %v1454_v38  ;;  %2450 = vmatprep.mubr.bf16.mxu0 %v1686_v59  ;;  %v1462_v42 = vmul.f32 0.01, %v1343_v37  ;;  %v1467_v1 = vmul.f32 0.01, %v1272_v10  ;;  %v1469_v39 = vmul.f32 0.01, %v1345_v51  ;;  %v1283_v17 = vpop.f32.mrf.mxu1 }
 0x25e   : > { %2451 = vmatmul.mubr.bf16.vlgmr.msra.gmra.mxu0 %v1685_v6  ;;  %vm1398_vm3 = vcmp.gt.f32.partialorder %v1343_v37, 0.0  ;;  %vm1403_vm4 = vcmp.gt.f32.partialorder %v1272_v10, 0.0  ;;  %vm1405_vm5 = vcmp.gt.f32.partialorder %v1345_v51, 0.0  ;;  %v1468_v18 = vmul.f32 0.01, %v1274_v46  ;;  %v1354_v53 = vpop.f32.mrf.mxu0  ;;  %v1587_v59 = vld [vmem:[#allocation7 + $0x120] sm:$0xff] }
 0x25f   : > { %v5093_v19 = vsel %vm1395_vm0, %v1268_v32, %v1459_v60  ;;  %vm1404_vm6 = vcmp.gt.f32.partialorder %v1274_v46, 0.0  ;;  %v1347_v23 = vadd.f32 %v1346_v55, %v4786_v8  ;;  %v5097_v61 = vadd.f32 %v1277_v41, %v4775_v57 }
 0x260   : > { %v5100_v4 = vsel %vm1397_vm1, %v1341_v45, %v1461_v34  ;;  %v5103_v9 = vadd.f32 %v1350_v33, %v4777_v58  ;;  %v1636_v0 = vmul.f32 %v1572_v16, %v1508_v31  ;;  %v1644_v63 = vmul.f32 %v1580_v48, %v1516_v12  ;;  %v1595_v16 = vld [vmem:[#allocation7 + $0x160] sm:$0xff] }
 0x261   : > { %v1524_v6 = vsel %vm1396_vm2, %v1270_v3, %v1460_v49  ;;  %v1526_v22 = vsel %vm1398_vm3, %v1343_v37, %v1462_v42  ;;  %v5108_v36 = vsel %vm1403_vm4, %v1272_v10, %v1467_v1  ;;  %v5111_v43 = vsel %vm1405_vm5, %v1345_v51, %v1469_v39  ;;  %v1590_v3 = vld [vmem:[#allocation7 + $0x138] sm:$0xff]  ;;  %v1356_v37 = vpop.f32.mrf.mxu0  ;;  %v1596_v51 = vld [vmem:[#allocation7 + $0x168] sm:$0xff]  ;;  %v1597_v42 = vld [vmem:[#allocation7 + $0x170] sm:$0xff] }
 0x262   : > { %v1532_v14 = vsel %vm1404_vm6, %v1274_v46, %v1468_v18  ;;  %vm1406_vm7 = vcmp.gt.f32.partialorder %v1347_v23, 0.0  ;;  %v1470_v20 = vmul.f32 0.01, %v1347_v23  ;;  %v1692_v28 = vpack.c.bf16 %v1644_v63, %v1636_v0 }
 0x263   : > { %v5115_v26 = vmul.f32 0.01, %v5097_v61  ;;  %v5118_v31 = vmul.f32 0.01, %v5103_v9  ;;  %v1638_v32 = vmul.f32 %v1574_v13, %v5069_v54  ;;  %v1646_v35 = vmul.f32 %v1582_v11, %v1518_v62  ;;  %v1589_v62 = vld [vmem:[#allocation7 + $0x130] sm:$0xff]  ;;  %v1606_v11 = vld [vmem:[#allocation7 + $0x1b8] sm:$0xff] }
 0x264   : > { %2393 = vmatprep.mubr.bf16.mxu1 %v1692_v28  ;;  %v1635_v56 = vmul.f32 %v1571_v24, %v5059_v27  ;;  %v1643_v55 = vmul.f32 %v1579_v15, %v5071_v5  ;;  %v1637_v41 = vmul.f32 %v1573_v47, %v5064_v21  ;;  %v1645_v12 = vmul.f32 %v1581_v29, %v5076_v2  ;;  %v1588_v5 = vld [vmem:[#allocation7 + $0x128] sm:$0xff]  ;;  %v1614_v24 = vld [vmem:[#allocation7 + $0x1f8] sm:$0xff] }
 0x265   : > { %v1694_v45 = vpack.c.bf16 %v1646_v35, %v1638_v32  ;;  %v1280_v38 = vadd.f32 %v1279_v40, %v4781_v44  ;;  %v1353_v50 = vadd.f32 %v1352_v7, %v4786_v8  ;;  %v1282_v30 = vadd.f32 %v1281_v25, %v4775_v57  ;;  %v1604_v7 = vld [vmem:[#allocation7 + $0x1a8] sm:$0xff] }
 0x266   : > { %vm1411_vm8 = vcmp.gt.f32.partialorder %v5097_v61, 0.0  ;;  %v1691_v54 = vpack.c.bf16 %v1643_v55, %v1635_v56  ;;  %v1693_v52 = vpack.c.bf16 %v1645_v12, %v1637_v41  ;;  %v1355_v60 = vadd.f32 %v1354_v53, %v4777_v58  ;;  %v1598_v58 = vld [vmem:[#allocation7 + $0x178] sm:$0xff]  ;;  %v1612_v25 = vld [vmem:[#allocation7 + $0x1e8] sm:$0xff]  ;;  %v1603_v56 = vld [vmem:[#allocation7 + $0x1a0] sm:$0xff] }
 0x267   : > { %v1284_v27 = vadd.f32 %v1283_v17, %v4781_v44  ;;  %2458 = vmatprep.mubr.bf16.mxu0 %v1694_v45  ;;  %vm1412_vm9 = vcmp.gt.f32.partialorder %v1280_v38, 0.0  ;;  %v1476_v21 = vmul.f32 0.01, %v1280_v38  ;;  %vm1414_vm10 = vcmp.gt.f32.partialorder %v1353_v50, 0.0  ;;  %v1613_v17 = vld [vmem:[#allocation7 + $0x1f0] sm:$0xff] }
 0x268   : > { %v1478_v2 = vmul.f32 0.01, %v1353_v50  ;;  %v1534_v10 = vsel %vm1406_vm7, %v1347_v23, %v1470_v20  ;;  %2394 = vmatmul.mubr.bf16.gmra.mxu1 %v1691_v54  ;;  %2459 = vmatmul.mubr.bf16.gmra.mxu0 %v1693_v52  ;;  %vm1419_vm11 = vcmp.gt.f32.partialorder %v1282_v30, 0.0  ;;  %v1483_v57 = vmul.f32 0.01, %v1282_v30  ;;  %v1605_v12 = vld [vmem:[#allocation7 + $0x1b0] sm:$0xff] }
 0x269   : > { %vm1421_vm12 = vcmp.gt.f32.partialorder %v1355_v60, 0.0  ;;  %v1540_v46 = vsel %vm1412_vm9, %v1280_v38, %v1476_v21  ;;  %v1485_v44 = vmul.f32 0.01, %v1355_v60  ;;  %vm1420_vm13 = vcmp.gt.f32.partialorder %v1284_v27, 0.0  ;;  %v4264_v52 = vld [vmem:[%s4671_s25] sm:$0xff]   ;;  %v4265_v21 = vld [vmem:[%s4671_s25 + $0x8] sm:$0xff]  }
 0x26a   : > { %v1484_v33 = vmul.f32 0.01, %v1284_v27  ;;  %v1542_v48 = vsel %vm1414_vm10, %v1353_v50, %v1478_v2  ;;  %v1547_v40 = vsel %vm1419_vm11, %v1282_v30, %v1483_v57  ;;  %v1357_v34 = vadd.f32 %v1356_v37, %v4786_v8  ;;  %v4266_v2 = vld [vmem:[%s4671_s25 + $0x10] sm:$0xff]   ;;  %v4267_v37 = vld [vmem:[%s4671_s25 + $0x18] sm:$0xff]  }
 0x26b   : > { %v1652_v49 = vmul.f32 %v1588_v5, %v1524_v6  ;;  %v1660_v39 = vmul.f32 %v1596_v51, %v1532_v14  ;;  %v1654_v18 = vmul.f32 %v1590_v3, %v1526_v22  ;;  %v1662_v23 = vmul.f32 %v1598_v58, %v1534_v10  ;;  %v4246_v5 = vld [vmem:[%s5457_s7 + $0x8] sm:$0xff]   ;;  %v4247_v3 = vld [vmem:[%s5457_s7] sm:$0xff]   ;;  %v4270_v57 = vld [vmem:[%s4671_s25 + $0x30] sm:$0xff]  }
 0x26c   : > { %v1548_v1 = vsel %vm1420_vm13, %v1284_v27, %v1484_v33  ;;  %vm1422_vm14 = vcmp.gt.f32.partialorder %v1357_v34, 0.0  ;;  %v1486_v0 = vmul.f32 0.01, %v1357_v34  ;;  %v1651_v63 = vmul.f32 %v1587_v59, %v5093_v19  ;;  %v4245_v27 = vld [vmem:[%s5457_s7 + $0x10] sm:$0xff]   ;;  %v4268_v59 = vld [vmem:[%s4671_s25 + $0x20] sm:$0xff]   ;;  %v4269_v10 = vld [vmem:[%s4671_s25 + $0x28] sm:$0xff]  }
 0x26d   : > { %v1659_v13 = vmul.f32 %v1595_v16, %v5108_v36  ;;  %v1700_v15 = vpack.c.bf16 %v1660_v39, %v1652_v49  ;;  %v1702_v47 = vpack.c.bf16 %v1662_v23, %v1654_v18  ;;  %v1653_v8 = vmul.f32 %v1589_v62, %v5100_v4  ;;  %v1611_v36 = vld [vmem:[#allocation7 + $0x1e0] sm:$0xff]  ;;  %v4271_v51 = vld [vmem:[%s4671_s25 + $0x38] sm:$0xff]  }
 0x26e   : > { %v1661_v6 = vmul.f32 %v1597_v42, %v5111_v43  ;;  %v1550_v29 = vsel %vm1422_vm14, %v1357_v34, %v1486_v0  ;;  %v1668_v22 = vmul.f32 %v1604_v7, %v1540_v46  ;;  %v1676_v20 = vmul.f32 %v1612_v25, %v1548_v1  ;;  %v4272_v58 = vld [vmem:[%s4671_s25 + $0x40] sm:$0xff]   ;;  %v4273_v46 = vld [vmem:[%s4671_s25 + $0x48] sm:$0xff]   ;;  %v4275_v33 = vld [vmem:[%s4671_s25 + $0x58] sm:$0xff]  }
 0x26f   : > { %v1699_v14 = vpack.c.bf16 %v1659_v13, %v1651_v63  ;;  %vm1413_vm15 = vcmp.gt.f32.partialorder %v5103_v9, 0.0  ;;  %2401 = vmatprep.mubr.bf16.mxu1 %v1700_v15  ;;  %2466 = vmatprep.mubr.bf16.mxu0 %v1702_v47  ;;  %v1670_v19 = vmul.f32 %v1606_v11, %v1542_v48  ;;  %v1678_v32 = vmul.f32 %v1614_v24, %v1550_v29  ;;  %v4248_v16 = vld [vmem:[%s5452_s2] sm:$0xff]   ;;  %v4278_v34 = vld [vmem:[%s4671_s25 + $0x70] sm:$0xff]   ;;  %v4279_v49 = vld [vmem:[%s4671_s25 + $0x78] sm:$0xff]  }
 0x270   : > { %v1701_v28 = vpack.c.bf16 %v1661_v6, %v1653_v8  ;;  %v1549_v35 = vsel %vm1421_vm12, %v1355_v60, %v1485_v44  ;;  %v1708_v53 = vpack.c.bf16 %v1676_v20, %v1668_v22  ;;  %v1539_v4 = vsel %vm1411_vm8, %v5097_v61, %v5115_v26  ;;  %v4240_v61 = vld [vmem:[%s5457_s7 + $0x38] sm:$0xff]   ;;  %v4242_v26 = vld [vmem:[%s5457_s7 + $0x28] sm:$0xff]   ;;  %v4274_v44 = vld [vmem:[%s4671_s25 + $0x50] sm:$0xff]  }
 0x271   : > { %2402 = vmatmul.mubr.bf16.gmra.mxu1 %v1699_v14  ;;  %v1710_v43 = vpack.c.bf16 %v1678_v32, %v1670_v19  ;;  %v1541_v55 = vsel %vm1413_vm15, %v5103_v9, %v5118_v31  ;;  %v1675_v41 = vmul.f32 %v1611_v36, %v1547_v40  ;;  %v1677_v45 = vmul.f32 %v1613_v17, %v1549_v35  ;;  %v4241_v9 = vld [vmem:[%s5457_s7 + $0x30] sm:$0xff]   ;;  %v4243_v31 = vld [vmem:[%s5457_s7 + $0x20] sm:$0xff]   ;;  %v4244_v60 = vld [vmem:[%s5457_s7 + $0x18] sm:$0xff]  }
 0x272   : > { %2467 = vmatmul.mubr.bf16.gmra.mxu0 %v1701_v28  ;;  %2409 = vmatprep.mubr.bf16.mxu1 %v1708_v53  ;;  %v1667_v38 = vmul.f32 %v1603_v56, %v1539_v4  ;;  %v1669_v50 = vmul.f32 %v1605_v12, %v1541_v55  ;;  %vm2831_vm0 = vcmask 523264   ;;  %v4276_v48 = vld [vmem:[%s4671_s25 + $0x60] sm:$0xff]   ;;  %v4277_v40 = vld [vmem:[%s4671_s25 + $0x68] sm:$0xff]  }
 0x273   : > { %2474 = vmatprep.mubr.bf16.mxu0 %v1710_v43  ;;  %3967 = vmatprep.subr.bf16.mxu1 %v4240_v61  ;;  %v4256_v62 = vld [vmem:[%s5452_s2 + $0x60] sm:$0xff]  }
 0x274   : > { %v1707_v30 = vpack.c.bf16 %v1675_v41, %v1667_v38  ;;  %v1709_v54 = vpack.c.bf16 %v1677_v45, %v1669_v50  ;;  %3968 = vmatpush3.bf16.msra.mxu1 %v4240_v61 }
 0x275   : > { %3969 = vmatprep.subr.bf16.mxu1 %v4241_v9 }
 0x278   : > { %3970 = vmatpush3.bf16.msra.mxu1 %v4241_v9 }
 0x279   : > { %2410 = vmatmul.mubr.bf16.gmra.mxu1 %v1707_v30  ;;  %3971 = vmatprep.subr.bf16.mxu1 %v4242_v26 }
 0x27a   : > { %2475 = vmatmul.mubr.bf16.gmra.mxu0 %v1709_v54  ;;  %3983 = vmatprep.mubr.bf16.mxu1 %v4264_v52 }
 0x27b   : > { %4023 = vmatprep.mubr.msk.bf16.mxu0 %vm2831_vm0, %v4248_v16 }
 0x27c   : > { %3972 = vmatpush3.bf16.msra.mxu1 %v4242_v26 }
 0x27d   : > { %3973 = vmatprep.subr.bf16.mxu1 %v4243_v31 }
 0x280   : > { %3974 = vmatpush3.bf16.msra.mxu1 %v4243_v31 }
 0x281   : > { %3975 = vmatprep.subr.bf16.mxu1 %v4244_v60 }
 0x284   : > { %3976 = vmatpush3.bf16.msra.mxu1 %v4244_v60 }
 0x285   : > { %3977 = vmatprep.subr.bf16.mxu1 %v4245_v27 }
 0x288   : > { %3978 = vmatpush3.bf16.msra.mxu1 %v4245_v27 }
 0x289   : > { %3979 = vmatprep.subr.bf16.mxu1 %v4246_v5 }
 0x28c   : > { %3980 = vmatpush3.bf16.msra.mxu1 %v4246_v5 }
 0x28d   : > { %3981 = vmatprep.subr.bf16.mxu1 %v4247_v3 }
 0x290   : > { %3982 = vmatpush3.bf16.msra.mxu1 %v4247_v3 }
 0x293   : > { %3984 = vmatmul.mubr.bf16.vlgmr.msra.gmra.mxu1 %v4265_v21 }
 0x294   : > { %3987 = vmatprep.mubr.bf16.mxu1 %v4266_v2 }
 0x29b   : > { %3988 = vmatmul.mubr.bf16.gmra.mxu1 %v4267_v37 }
 0x29c   : > { %3991 = vmatprep.mubr.bf16.mxu1 %v4268_v59 }
 0x2a3   : > { %3992 = vmatmul.mubr.bf16.gmra.mxu1 %v4269_v10 }
 0x2a4   : > { %3995 = vmatprep.mubr.bf16.mxu1 %v4270_v57 }
 0x2ab   : > { %3996 = vmatmul.mubr.bf16.gmra.mxu1 %v4271_v51 }
 0x2ac   : > { %3999 = vmatprep.mubr.bf16.mxu1 %v4272_v58 }
 0x2b3   : > { %4000 = vmatmul.mubr.bf16.gmra.mxu1 %v4273_v46 }
 0x2b4   : > { %4003 = vmatprep.mubr.bf16.mxu1 %v4274_v44 }
 0x2bb   : > { %4004 = vmatmul.mubr.bf16.gmra.mxu1 %v4275_v33 }
 0x2bc   : > { %4007 = vmatprep.mubr.bf16.mxu1 %v4276_v48 }
 0x2c3   : > { %4008 = vmatmul.mubr.bf16.gmra.mxu1 %v4277_v40 }
 0x2c4   : > { %4011 = vmatprep.mubr.bf16.mxu1 %v4278_v34 }
 0x2cb   : > { %4012 = vmatmul.mubr.bf16.gmra.mxu1 %v4279_v49 }
 0x2cc   : > { %4047 = vmatprep.mubr.msk.bf16.mxu1 %vm2831_vm0, %v4256_v62 }
 0x2f0   : > { %v3779_v42 = vpop.f32.mrf.mxu1 }
 0x2f2   : > { %v3819_v1 = vpop.f32.mrf.mxu0  ;;  %v3780_v39 = vpop.f32.mrf.mxu1 }
 0x2f3   : > { %v3781_v18 = vadd.f32 %v3780_v39, %v3779_v42 }
 0x2f4   : > { %v3820_v23 = vpop.f32.mrf.mxu0  ;;  %v3782_v7 = vpop.f32.mrf.mxu1 }
 0x2f5   : > { %v3821_v25 = vadd.f32 %v3820_v23, %v3819_v1 }
 0x2f6   : > { %v3822_v0 = vpop.f32.mrf.mxu0  ;;  %v3783_v63 = vpop.f32.mrf.mxu1 }
 0x2f7   : > { %v2323_v13 = vadd.f32 %v3821_v25, %v3781_v18  ;;  %v3784_v11 = vadd.f32 %v3783_v63, %v3782_v7 }
 0x2f8   : > { %v3823_v24 = vpop.f32.mrf.mxu0 }
 0x2f9   : > { %v3824_v15 = vadd.f32 %v3823_v24, %v3822_v0 }
 0x2fb   : > { %v2326_v47 = vadd.f32 %v3824_v15, %v3784_v11  ;;  %v5194_v8 = vpop.f32.mrf.mxu1 }
 0x2fc   : > { %v5196_v6 = vpop.f32.mrf.mxu0 }
 0x2fd   : > { %v5198_v29 = vpop.f32.mrf.mxu1 }
 0x2fe   : > { %v5200_v14 = vpop.f32.mrf.mxu0 }
 0x2ff   : > { %v5202_v22 = vpop.f32.mrf.mxu1 }
 0x300   : > { %v5204_v20 = vpop.f32.mrf.mxu0 }
 0x301   : > { %v5206_v28 = vpop.f32.mrf.mxu1 }
 0x302   : > { %v5208_v19 = vpop.f32.mrf.mxu0 }
 0x307   : > { %v3791_v32 = vpop.f32.mrf.mxu1 }
 0x308   : > { %v3831_v36 = vpop.f32.mrf.mxu0 }
 0x309   : > { %v3792_v35 = vpop.f32.mrf.mxu1 }
 0x30a   : > { %v3832_v53 = vpop.f32.mrf.mxu0 }
 0x30b   : > { %v3794_v17 = vpop.f32.mrf.mxu1 }
 0x30c   : > { %v3834_v4 = vpop.f32.mrf.mxu0 }
 0x30d   : > { %v3795_v43 = vpop.f32.mrf.mxu1 }
 0x30e   : > { %v3835_v56 = vpop.f32.mrf.mxu0  ;;  %v3796_v63 = vadd.f32 %v3795_v43, %v3794_v17 }
 0x313   : > { %v3797_v55 = vpop.f32.mrf.mxu1 }
 0x314   : > { %v3837_v41 = vpop.f32.mrf.mxu0 }
 0x315   : > { %v3798_v12 = vpop.f32.mrf.mxu1 }
 0x316   : > { %v3838_v45 = vpop.f32.mrf.mxu0  ;;  %v3799_v11 = vadd.f32 %v3798_v12, %v3797_v55 }
 0x317   : > { %v3800_v38 = vpop.f32.mrf.mxu1  ;;  %v3839_v24 = vadd.f32 %v3838_v45, %v3837_v41 }
 0x318   : > { %v3840_v50 = vpop.f32.mrf.mxu0 }
 0x319   : > { %v3801_v30 = vpop.f32.mrf.mxu1  ;;  %v2347_v43 = vadd.f32 %v3839_v24, %v3799_v11 }
 0x31a   : > { %v3841_v54 = vpop.f32.mrf.mxu0 }
 0x31c   : > { %v3859_v52 = vpop.f32.mrf.mxu1 }
 0x31e   : > { %v3899_v61 = vpop.f32.mrf.mxu0  ;;  %v3860_v9 = vpop.f32.mrf.mxu1 }
 0x31f   : > { %v3861_v26 = vadd.f32 %v3860_v9, %v3859_v52  ;;  %v3833_v52 = vadd.f32 %v3832_v53, %v3831_v36  ;;  %v3802_v9 = vadd.f32 %v3801_v30, %v3800_v38  ;;  %v3827_v36 = vadd.f32 %v5200_v14, %v5196_v6 }
 0x320   : > { %v3900_v31 = vpop.f32.mrf.mxu0  ;;  %v3862_v60 = vpop.f32.mrf.mxu1 }
 0x321   : > { %v2388_v3 = vadd.f32 %v3861_v26, %v2323_v13  ;;  %v3901_v37 = vadd.f32 %v3900_v31, %v3899_v61  ;;  %v3836_v13 = vadd.f32 %v3835_v56, %v3834_v4  ;;  %v3842_v26 = vadd.f32 %v3841_v54, %v3840_v50 }
 0x322   : > { %v3902_v27 = vpop.f32.mrf.mxu0  ;;  %v3863_v5 = vpop.f32.mrf.mxu1 }
 0x323   : > { %v3864_v21 = vadd.f32 %v3863_v5, %v3862_v60  ;;  %v2453_v57 = vadd.f32 %v3901_v37, %v2388_v3  ;;  %v3790_v5 = vadd.f32 %v5206_v28, %v5202_v22  ;;  %v3830_v3 = vadd.f32 %v5208_v19, %v5204_v20 }
 0x324   : > { %v3903_v2 = vpop.f32.mrf.mxu0  ;;  %v2342_v4 = vadd.f32 %v3836_v13, %v3796_v63  ;;  %v2350_v41 = vadd.f32 %v3842_v26, %v3802_v9  ;;  %v4262_v63 = vld [vmem:[%s5452_s2 + $0x50] sm:$0xff]   ;;  %v4263_v13 = vld [vmem:[%s5452_s2 + $0x58] sm:$0xff]  }
 0x325   : > { %v2391_v59 = vadd.f32 %v3864_v21, %v2326_v47  ;;  %v3904_v10 = vadd.f32 %v3903_v2, %v3902_v27  ;;  %v3793_v47 = vadd.f32 %v3792_v35, %v3791_v32  ;;  %v3787_v32 = vadd.f32 %v5198_v29, %v5194_v8 }
 0x326   : > { %v2334_v20 = vadd.f32 %v3830_v3, %v3790_v5 }
 0x327   : > { %v2456_v51 = vadd.f32 %v3904_v10, %v2391_v59  ;;  %v2339_v35 = vadd.f32 %v3833_v52, %v3793_v47  ;;  %v2331_v37 = vadd.f32 %v3827_v36, %v3787_v32 }
 0x328   : > { %v3865_v58 = vpop.f32.mrf.mxu1  ;;  %v5210_v46 = vpop.f32.mrf.mxu0 }
 0x329   : > { %v5212_v44 = vpack.c.bf16 %v2456_v51, %v2453_v57 }
 0x32a   : > { %v3866_v33 = vpop.f32.mrf.mxu1  ;;  %v3906_v16 = vpop.f32.mrf.mxu0 }
 0x32b   : > { %v3867_v19 = vadd.f32 %v3866_v33, %v3865_v58 }
 0x32c   : > { %v3868_v48 = vpop.f32.mrf.mxu1  ;;  %v3908_v40 = vpop.f32.mrf.mxu0 }
 0x32d   : > { %v2396_v10 = vadd.f32 %v3867_v19, %v2331_v37 }
 0x32e   : > { %v3869_v34 = vpop.f32.mrf.mxu1  ;;  %v3909_v49 = vpop.f32.mrf.mxu0 }
 0x32f   : > { %v3870_v53 = vadd.f32 %v3869_v34, %v3868_v48  ;;  %v3910_v57 = vadd.f32 %v3909_v49, %v3908_v40  ;;  %v3907_v34 = vadd.f32 %v3906_v16, %v5210_v46  ;;  %v4249_v46 = vld [vmem:[%s5452_s2 + $0x8] sm:$0xff]   ;;  %v4250_v40 = vld [vmem:[%s5452_s2 + $0x10] sm:$0xff]  }
 0x330   : > { %v4257_v16 = vld [vmem:[%s5452_s2 + $0x68] sm:$0xff]   ;;  %v4260_v49 = vld [vmem:[%s5452_s2 + $0x70] sm:$0xff]  }
 0x331   : > { %v3871_v62 = vpop.f32.mrf.mxu1  ;;  %v2399_v8 = vadd.f32 %v3870_v53, %v2334_v20  ;;  %v2461_v58 = vadd.f32 %v3907_v34, %v2396_v10 }
 0x332   : > { %v3911_v42 = vpop.f32.mrf.mxu0 }
 0x333   : > { %v3872_v1 = vpop.f32.mrf.mxu1 }
 0x334   : > { %v3912_v39 = vpop.f32.mrf.mxu0  ;;  %v3873_v21 = vadd.f32 %v3872_v1, %v3871_v62  ;;  %v2464_v62 = vadd.f32 %v3910_v57, %v2399_v8 }
 0x335   : > { %v3874_v18 = vpop.f32.mrf.mxu1  ;;  %v3913_v29 = vadd.f32 %v3912_v39, %v3911_v42  ;;  %v4261_v42 = vld [vmem:[%s5452_s2 + $0x78] sm:$0xff]   ;;  %v4252_v39 = vld [vmem:[%s5452_s2 + $0x20] sm:$0xff]  }
 0x336   : > { %v3914_v23 = vpop.f32.mrf.mxu0  ;;  %v2404_v38 = vadd.f32 %v3873_v21, %v2339_v35  ;;  %v2484_v33 = vpack.c.bf16 %v2464_v62, %v2461_v58 }
 0x337   : > { %v3875_v7 = vpop.f32.mrf.mxu1 }
 0x338   : > { %v3915_v25 = vpop.f32.mrf.mxu0  ;;  %v3876_v31 = vadd.f32 %v3875_v7, %v3874_v18  ;;  %v2469_v51 = vadd.f32 %v3913_v29, %v2404_v38  ;;  %v4253_v18 = vld [vmem:[%s5452_s2 + $0x28] sm:$0xff]   ;;  %v4255_v7 = vld [vmem:[%s5452_s2 + $0x38] sm:$0xff]  }
 0x339   : > { %v3877_v0 = vpop.f32.mrf.mxu1  ;;  %v3916_v50 = vadd.f32 %v3915_v25, %v3914_v23  ;;  %v4254_v23 = vld [vmem:[%s5452_s2 + $0x30] sm:$0xff]   ;;  %v4258_v25 = vld [vmem:[%s5452_s2 + $0x40] sm:$0xff]  }
 0x33a   : > { %v3917_v15 = vpop.f32.mrf.mxu0  ;;  %v2407_v12 = vadd.f32 %v3876_v31, %v2342_v4 }
 0x33b   : > { %v3878_v61 = vpop.f32.mrf.mxu1 }
 0x33c   : > { %v3879_v60 = vadd.f32 %v3878_v61, %v3877_v0  ;;  %v3918_v27 = vpop.f32.mrf.mxu0  ;;  %v2472_v59 = vadd.f32 %v3916_v50, %v2407_v12  ;;  %v4259_v0 = vld [vmem:[%s5452_s2 + $0x48] sm:$0xff]  }
 0x33d   : > { %v3880_v17 = vpop.f32.mrf.mxu1  ;;  %v3919_v30 = vadd.f32 %v3918_v27, %v3917_v15 }
 0x33e   : > { %v3920_v56 = vpop.f32.mrf.mxu0  ;;  %v2412_v22 = vadd.f32 %v3879_v60, %v2347_v43  ;;  %v2485_v1 = vpack.c.bf16 %v2472_v59, %v2469_v51 }
 0x33f   : > { %v3881_v55 = vpop.f32.mrf.mxu1 }
 0x340   : > { %v3882_v28 = vadd.f32 %v3881_v55, %v3880_v17  ;;  %v3921_v45 = vpop.f32.mrf.mxu0  ;;  %v2477_v6 = vadd.f32 %v3919_v30, %v2412_v22  ;;  %v5326_v30 = vld [vmem:[%s5458_s8] ss:$0 sm:$0xff] }
 0x341   : > { %v3922_v2 = vadd.f32 %v3921_v45, %v3920_v56 }
 0x342   : > { %v2415_v54 = vadd.f32 %v3882_v28, %v2350_v41 }
 0x344   : > { %v2480_v14 = vadd.f32 %v3922_v2, %v2415_v54 }
 0x346   : > { %v2486_v48 = vpack.c.bf16 %v2480_v14, %v2477_v6 }
 0x348   : > { %4015 = vmatprep.subr.bf16.mxu0 %v2486_v48  ;;  %4055 = vmatprep.subr.bf16.mxu1 %v2486_v48 }
 0x349   : > { %4016 = vmatpush3.bf16.msra.mxu0 %v2486_v48  ;;  %4059 = vmatpush3.bf16.msra.mxu1 %v2486_v48 }
 0x34a   : > { %4017 = vmatprep.subr.bf16.mxu0 %v2485_v1  ;;  %4056 = vmatprep.subr.bf16.mxu1 %v2485_v1 }
 0x34d   : > { %4018 = vmatpush3.bf16.msra.mxu0 %v2485_v1  ;;  %4060 = vmatpush3.bf16.msra.mxu1 %v2485_v1 }
 0x34e   : > { %4019 = vmatprep.subr.bf16.mxu0 %v2484_v33  ;;  %4057 = vmatprep.subr.bf16.mxu1 %v2484_v33 }
 0x351   : > { %4020 = vmatpush3.bf16.msra.mxu0 %v2484_v33  ;;  %4061 = vmatpush3.bf16.msra.mxu1 %v2484_v33 }
 0x352   : > { %4021 = vmatprep.subr.bf16.mxu0 %v5212_v44  ;;  %4058 = vmatprep.subr.bf16.mxu1 %v5212_v44 }
 0x353   : > { %v3985_v11 = vpop.f32.mrf.mxu1 }
 0x354   : > { %v2601_v14 = vadd.f32 %v3985_v11, %v5326_v30 }
 0x355   : > { %4022 = vmatpush3.bf16.msra.mxu0 %v5212_v44  ;;  %4062 = vmatpush3.bf16.msra.mxu1 %v5212_v44  ;;  %v4251_v44 = vld [vmem:[%s5452_s2 + $0x18] sm:$0xff]   ;;  %v2592_v24 = vpop.f32.mrf.mxu1 }
 0x356   : > { %v2593_v48 = vadd.f32 %v5326_v30, %v2592_v24 }
 0x357   : > { %v3986_v15 = vpop.f32.mrf.mxu1 }
 0x358   : > { %4024 = vmatmul.mubr.msk.bf16.vlgmr.msra.gmra.mxu0 %vm2831_vm0, %v4249_v46  ;;  %4048 = vmatmul.mubr.msk.bf16.vlgmr.msra.gmra.mxu1 %vm2831_vm0, %v4257_v16  ;;  %v2604_v10 = vadd.f32 %v3986_v15, %v5326_v30 }
 0x359   : > { %4027 = vmatprep.mubr.msk.bf16.mxu0 %vm2831_vm0, %v4250_v40  ;;  %4051 = vmatprep.mubr.msk.bf16.mxu1 %vm2831_vm0, %v4260_v49  ;;  %v2595_v47 = vpop.f32.mrf.mxu1 }
 0x35a   : > { %v2596_v34 = vadd.f32 %v5326_v30, %v2595_v47 }
 0x35b   : > { %v5283_v52 = vpop.f32.mrf.mxu1 }
 0x35d   : > { %v5285_v61 = vpop.f32.mrf.mxu1 }
 0x35f   : > { %v5287_v9 = vpop.f32.mrf.mxu1 }
 0x360   : > { %4028 = vmatmul.mubr.msk.bf16.gmra.mxu0 %vm2831_vm0, %v4251_v44  ;;  %4052 = vmatmul.mubr.msk.bf16.gmra.mxu1 %vm2831_vm0, %v4261_v42 }
 0x361   : > { %4031 = vmatprep.mubr.msk.bf16.mxu0 %vm2831_vm0, %v4252_v39  ;;  %v5289_v26 = vpop.f32.mrf.mxu1 }
 0x363   : > { %v5291_v31 = vpop.f32.mrf.mxu1 }
 0x365   : > { %v5293_v60 = vpop.f32.mrf.mxu1 }
 0x367   : > { %v5295_v27 = vpop.f32.mrf.mxu1 }
 0x368   : > { %4032 = vmatmul.mubr.msk.bf16.gmra.mxu0 %vm2831_vm0, %v4253_v18 }
 0x369   : > { %4035 = vmatprep.mubr.msk.bf16.mxu0 %vm2831_vm0, %v4254_v23  ;;  %v5297_v5 = vpop.f32.mrf.mxu1 }
 0x36b   : > { %v5299_v3 = vpop.f32.mrf.mxu1 }
 0x36d   : > { %v5301_v21 = vpop.f32.mrf.mxu1 }
 0x36f   : > { %v5303_v17 = vpop.f32.mrf.mxu1 }
 0x370   : > { %4036 = vmatmul.mubr.msk.bf16.gmra.mxu0 %vm2831_vm0, %v4255_v7 }
 0x371   : > { %4039 = vmatprep.mubr.msk.bf16.mxu0 %vm2831_vm0, %v4258_v25  ;;  %v5305_v4 = vpop.f32.mrf.mxu1 }
 0x373   : > { %v5307_v43 = vpop.f32.mrf.mxu1 }
 0x375   : > { %v5309_v56 = vpop.f32.mrf.mxu1 }
 0x377   : > { %v5311_v32 = vpop.f32.mrf.mxu1 }
 0x378   : > { %4040 = vmatmul.mubr.msk.bf16.gmra.mxu0 %vm2831_vm0, %v4259_v0 }
 0x379   : > { %4043 = vmatprep.mubr.msk.bf16.mxu0 %vm2831_vm0, %v4262_v63  ;;  %v5313_v36 = vpop.f32.mrf.mxu1 }
 0x37b   : > { %v5315_v35 = vpop.f32.mrf.mxu1 }
 0x37d   : > { %v5317_v53 = vpop.f32.mrf.mxu1 }
 0x37f   : > { %v5319_v55 = vpop.f32.mrf.mxu1 }
 0x380   : > { %4044 = vmatmul.mubr.msk.bf16.gmra.mxu0 %vm2831_vm0, %v4263_v13 }
 0x381   : > { %v5321_v41 = vpop.f32.mrf.mxu1 }
 0x383   : > { %v4009_v12 = vpop.f32.mrf.mxu1 }
 0x384   : > { %v2697_v54 = vadd.f32 %v4009_v12, %v5326_v30  ;;  %v2617_v12 = vadd.f32 %v5283_v52, %v5326_v30 }
 0x385   : > { %v2688_v22 = vpop.f32.mrf.mxu1 }
 0x386   : > { %v2689_v8 = vadd.f32 %v5326_v30, %v2688_v22  ;;  %v2620_v22 = vadd.f32 %v5287_v9, %v5326_v30 }
 0x387   : > { %v4010_v28 = vpop.f32.mrf.mxu1 }
 0x388   : > { %v2700_v29 = vadd.f32 %v4010_v28, %v5326_v30 }
 0x389   : > { %v2691_v45 = vpop.f32.mrf.mxu1 }
 0x38a   : > { %v2692_v57 = vadd.f32 %v5326_v30, %v2691_v45 }
 0x38b   : > { %v4013_v20 = vpop.f32.mrf.mxu1 }
 0x38c   : > { %v2713_v44 = vadd.f32 %v4013_v20, %v5326_v30  ;;  %v2609_v20 = vadd.f32 %v5326_v30, %v5285_v61 }
 0x38d   : > { %v2704_v19 = vpop.f32.mrf.mxu1 }
 0x38e   : > { %v2705_v13 = vadd.f32 %v5326_v30, %v2704_v19  ;;  %v2612_v19 = vadd.f32 %v5326_v30, %v5289_v26 }
 0x38f   : > { %v4014_v38 = vpop.f32.mrf.mxu1 }
 0x390   : > { %v2716_v11 = vadd.f32 %v4014_v38, %v5326_v30 }
 0x391   : > { %v2707_v50 = vpop.f32.mrf.mxu1 }
 0x392   : > { %v2708_v28 = vadd.f32 %v5326_v30, %v2707_v50 }
 0x418   : > { %v4025_v2 = vpop.f32.mrf.mxu0  ;;  %v4049_v37 = vpop.f32.mrf.mxu1 }
 0x419   : > { %v3067_v51 = vadd.f32 %v4049_v37, %v2697_v54  ;;  %v3043_v58 = vadd.f32 %v4025_v2, %v2601_v14 }
 0x41a   : > { %v2914_v59 = vpop.f32.mrf.mxu0  ;;  %v3010_v6 = vpop.f32.mrf.mxu1 }
 0x41b   : > { %v3065_v46 = vadd.f32 %v3010_v6, %v2689_v8  ;;  %v3041_v40 = vadd.f32 %v2914_v59, %v2593_v48  ;;  %v2633_v48 = vadd.f32 %v5291_v31, %v5326_v30 }
 0x41c   : > { %v4026_v62 = vpop.f32.mrf.mxu0  ;;  %v4050_v1 = vpop.f32.mrf.mxu1 }
 0x41d   : > { %v3044_v33 = vadd.f32 %v4026_v62, %v2604_v10  ;;  %v3068_v16 = vadd.f32 %v4050_v1, %v2700_v29  ;;  %v2625_v1 = vadd.f32 %v5326_v30, %v5293_v60  ;;  %v2652_v60 = vadd.f32 %v5303_v17, %v5326_v30 }
 0x41e   : > { %v2917_v49 = vpop.f32.mrf.mxu0  ;;  %v3013_v42 = vpop.f32.mrf.mxu1 }
 0x41f   : > { %v3636_v39 = vpack.c.bf16 %v3044_v33, %v3043_v58  ;;  %v3042_v18 = vadd.f32 %v2917_v49, %v2596_v34  ;;  %v3696_v23 = vpack.c.bf16 %v3068_v16, %v3067_v51  ;;  %v3066_v7 = vadd.f32 %v3013_v42, %v2692_v57 }
 0x420   : > { %v4029_v25 = vpop.f32.mrf.mxu0  ;;  %v4053_v0 = vpop.f32.mrf.mxu1  ;;  %v2636_v34 = vadd.f32 %v5295_v27, %v5326_v30  ;;  %v2628_v58 = vadd.f32 %v5326_v30, %v5297_v5 }
 0x421   : > { %3708 = vst [vmem:[%s5339_s22 + $0x8] sm:$0xff] %v3636_v39   ;;  %v3631_v63 = vpack.c.bf16 %v3042_v18, %v3041_v40  ;;  %3720 = vst [vmem:[%s5339_s22 + $0x68] sm:$0xff] %v3696_v23   ;;  %v3691_v24 = vpack.c.bf16 %v3066_v7, %v3065_v46  ;;  %v3071_v45 = vadd.f32 %v4053_v0, %v2713_v44 }
 0x422   : > { %v2930_v15 = vpop.f32.mrf.mxu0  ;;  %v3026_v47 = vpop.f32.mrf.mxu1  ;;  %v3047_v2 = vadd.f32 %v4029_v25, %v2617_v12  ;;  %v2649_v39 = vadd.f32 %v5299_v3, %v5326_v30  ;;  %v2641_v18 = vadd.f32 %v5326_v30, %v5301_v21  ;;  %v2644_v23 = vadd.f32 %v5326_v30, %v5305_v4 }
 0x423   : > { %3632 = vst [vmem:[%s5339_s22] sm:$0xff] %v3631_v63   ;;  %3719 = vst [vmem:[%s5339_s22 + $0x60] sm:$0xff] %v3691_v24   ;;  %v3069_v37 = vadd.f32 %v3026_v47, %v2705_v13  ;;  %v3045_v9 = vadd.f32 %v2930_v15, %v2609_v20  ;;  %v2665_v15 = vadd.f32 %v5307_v43, %v5326_v30 }
 0x424   : > { %v4030_v38 = vpop.f32.mrf.mxu0  ;;  %v4054_v54 = vpop.f32.mrf.mxu1  ;;  %v2668_v21 = vadd.f32 %v5311_v32, %v5326_v30  ;;  %v2657_v47 = vadd.f32 %v5326_v30, %v5309_v56  ;;  %v2660_v12 = vadd.f32 %v5326_v30, %v5313_v36  ;;  %v2684_v56 = vadd.f32 %v5319_v55, %v5326_v30 }
 0x425   : > { %v3048_v52 = vadd.f32 %v4030_v38, %v2620_v22  ;;  %v3072_v8 = vadd.f32 %v4054_v54, %v2716_v11 }
 0x426   : > { %v2933_v50 = vpop.f32.mrf.mxu0  ;;  %v3029_v29 = vpop.f32.mrf.mxu1 }
 0x427   : > { %v3646_v59 = vpack.c.bf16 %v3048_v52, %v3047_v2  ;;  %v3046_v6 = vadd.f32 %v2933_v50, %v2612_v19  ;;  %v3706_v14 = vpack.c.bf16 %v3072_v8, %v3071_v45  ;;  %v3070_v61 = vadd.f32 %v3029_v29, %v2708_v28 }
 0x428   : > { %v4033_v10 = vpop.f32.mrf.mxu0  ;;  %v2681_v2 = vadd.f32 %v5315_v35, %v5326_v30  ;;  %v2673_v52 = vadd.f32 %v5326_v30, %v5317_v53 }
 0x429   : > { %3710 = vst [vmem:[%s5339_s22 + $0x18] sm:$0xff] %v3646_v59   ;;  %v3641_v57 = vpack.c.bf16 %v3046_v6, %v3045_v9  ;;  %3722 = vst [vmem:[%s5339_s22 + $0x78] sm:$0xff] %v3706_v14   ;;  %v3701_v26 = vpack.c.bf16 %v3070_v61, %v3069_v37  ;;  %v3051_v33 = vadd.f32 %v4033_v10, %v2633_v48 }
 0x42a   : > { %v2946_v51 = vpop.f32.mrf.mxu0  ;;  %v2676_v37 = vadd.f32 %v5326_v30, %v5321_v41 }
 0x42b   : > { %3709 = vst [vmem:[%s5339_s22 + $0x10] sm:$0xff] %v3641_v57   ;;  %3721 = vst [vmem:[%s5339_s22 + $0x70] sm:$0xff] %v3701_v26   ;;  %v3049_v40 = vadd.f32 %v2946_v51, %v2625_v1 }
 0x42c   : > { %v4034_v62 = vpop.f32.mrf.mxu0 }
 0x42d   : > { %v3052_v46 = vadd.f32 %v4034_v62, %v2636_v34 }
 0x42e   : > { %v2949_v16 = vpop.f32.mrf.mxu0 }
 0x42f   : > { %v3656_v49 = vpack.c.bf16 %v3052_v46, %v3051_v33  ;;  %v3050_v44 = vadd.f32 %v2949_v16, %v2628_v58 }
 0x430   : > { %v4037_v31 = vpop.f32.mrf.mxu0 }
 0x431   : > { %3712 = vst [vmem:[%s5339_s22 + $0x28] sm:$0xff] %v3656_v49   ;;  %v3651_v27 = vpack.c.bf16 %v3050_v44, %v3049_v40  ;;  %v3055_v7 = vadd.f32 %v4037_v31, %v2649_v39 }
 0x432   : > { %v2962_v42 = vpop.f32.mrf.mxu0 }
 0x433   : > { %3711 = vst [vmem:[%s5339_s22 + $0x20] sm:$0xff] %v3651_v27   ;;  %v3053_v63 = vadd.f32 %v2962_v42, %v2641_v18 }
 0x434   : > { %v4038_v5 = vpop.f32.mrf.mxu0 }
 0x435   : > { %v3056_v25 = vadd.f32 %v4038_v5, %v2652_v60 }
 0x436   : > { %v2965_v0 = vpop.f32.mrf.mxu0 }
 0x437   : > { %v3666_v13 = vpack.c.bf16 %v3056_v25, %v3055_v7  ;;  %v3054_v11 = vadd.f32 %v2965_v0, %v2644_v23 }
 0x438   : > { %v4041_v24 = vpop.f32.mrf.mxu0 }
 0x439   : > { %3714 = vst [vmem:[%s5339_s22 + $0x38] sm:$0xff] %v3666_v13   ;;  %v3661_v3 = vpack.c.bf16 %v3054_v11, %v3053_v63  ;;  %v3059_v22 = vadd.f32 %v4041_v24, %v2665_v15 }
 0x43a   : > { %v2978_v17 = vpop.f32.mrf.mxu0 }
 0x43b   : > { %3713 = vst [vmem:[%s5339_s22 + $0x30] sm:$0xff] %v3661_v3   ;;  %v3057_v20 = vadd.f32 %v2978_v17, %v2657_v47 }
 0x43c   : > { %v4042_v4 = vpop.f32.mrf.mxu0 }
 0x43d   : > { %v3060_v28 = vadd.f32 %v4042_v4, %v2668_v21 }
 0x43e   : > { %v2981_v45 = vpop.f32.mrf.mxu0 }
 0x43f   : > { %v3676_v19 = vpack.c.bf16 %v3060_v28, %v3059_v22  ;;  %v3058_v43 = vadd.f32 %v2981_v45, %v2660_v12 }
 0x440   : > { %v4045_v38 = vpop.f32.mrf.mxu0 }
 0x441   : > { %3716 = vst [vmem:[%s5339_s22 + $0x48] sm:$0xff] %v3676_v19   ;;  %v3671_v32 = vpack.c.bf16 %v3058_v43, %v3057_v20  ;;  %v3063_v8 = vadd.f32 %v4045_v38, %v2681_v2 }
 0x442   : > { %v2994_v54 = vpop.f32.mrf.mxu0 }
 0x443   : > { %3715 = vst [vmem:[%s5339_s22 + $0x40] sm:$0xff] %v3671_v32   ;;  %v3061_v50 = vadd.f32 %v2994_v54, %v2673_v52 }
 0x444   : > { %v4046_v36 = vpop.f32.mrf.mxu0 }
 0x445   : > { %v3064_v9 = vadd.f32 %v4046_v36, %v2684_v56 }
 0x446   : > { %v2997_v35 = vpop.f32.mrf.mxu0 }
 0x447   : > { %v3686_v29 = vpack.c.bf16 %v3064_v9, %v3063_v8  ;;  %v3062_v59 = vadd.f32 %v2997_v35, %v2676_v37 }
 0x449   : > { %3718 = vst [vmem:[%s5339_s22 + $0x58] sm:$0xff] %v3686_v29   ;;  %v3681_v53 = vpack.c.bf16 %v3062_v59, %v3061_v50 }
 0x44b   : > { %3717 = vst [vmem:[%s5339_s22 + $0x50] sm:$0xff] %v3681_v53  }
 0x44c   : > { %4399 = shalt.err (!%p4396_p9)
}
 0x44d   : > { %s4400_s25 = scalar_lea.hbm %s5403_s3, 2048  ;;  %s4404_s20 = scalar_lea.hbm %s5459_s9, 4096 }
 0x44e   : > { %p4401_p7 = scmp.ne.s32.totalorder %s5403_s3, %s4400_s25  ;;  %p4405_p1 = scmp.lt.s32.totalorder %s5403_s3, %s5459_s9 }
 0x44f   : > { %p4406_p11 = scmp.lt.s32.totalorder %s4404_s20, %s4400_s25 }
 0x450   : > { %p4402_p4 = pnand %p4401_p7, %p5487_p0 }
 0x451   : > { %p4407_p13 = por %p4406_p11, %p4405_p1 }
 0x452   : > { %p4403_p8 = pneg %p4402_p4 }
 0x454   : > { %p4408_p12 = pnand %p4407_p13, %p4403_p8 }
 0x456   : > { %4411 = shalt.err (!%p4408_p12)
}
 0x457   : > { %s4471_s21 = smov 64   ;;  %s4472_s23 = smov 4  }
 0x458   : > { %4077 = dma.vmem_to_hbm [thread:$0]  (%p5487_p0), %s5405_s28, 2048, %s5403_s3, %s3234_s24, %s4471_s21, %s4471_s21, %s4472_s23  }
 0x459 PF: > { %s3262_s13 = sand.u32 1, %s4446_s30   ;;  %p5488_p5 = scmp.ne.s32.totalorder %s5470_s16, 0 }
 0x45a   : > { %p5489_p10 = scmp.ge.s32.totalorder %s4458_s12, 2  ;;  %s3263_s19 = scalar_lea.sflag [#allocation4], %s3262_s13 }
 0x45c   : > { %p4094_p2 = pnand %p5489_p10, %p5488_p5 }
 0x45e   : > { %p4095_p6 = pneg %p4094_p2 }
 0x460   : > { %4441 = dma.done.wait (%p4095_p6), %s3263_s19, 2048  }
 0x461   : > { %4443 = vsyncadd (%p4095_p6), %s3263_s19, 4294965248  ;;  %p24_p3 = scmp.ge.s32.totalorder %s4607_s27, 4   ;;  %s5490_s30 = smov %s4450_s10 }
 0x462   : > { %s5491_s10 = smov %s4454_s11  ;;  %s5492_s11 = smov %s4623_s18 }
 0x463   : > { %s5493_s12 = smov %s4607_s27  ;;  %26 = sbr.rel (!%p24_p3) target bundleno = 11 (0xb), region = 113 }
 0x468   :  { %3268 = vsyncpa [#allocation3], 1 }
 0x469   :  { %3270 = vsyncpa [#allocation3 + $0x1], 1 }
 0x46a   :  { %3271 = vsyncpa [#allocation6], 1 }
 0x46b   :  { %3272 = vsyncpa [#allocation9], 1 }
 0x46c   :  { %3273 = vsyncpa [#allocation4], 1 }
 0x46d   :  { %3275 = vsyncpa [#allocation4 + $0x1], 1 }

</bundles_post_ra>
